<compile_context>
chip_gen: v7x
topology: tpu7x:2x2x1
jax: 0.10.0
libtpu: 0.0.40
codegen_flags: <defaults>
</compile_context>

<pallas_src>
import functools

import jax
import jax.numpy as jnp
from jax import lax
from jax.experimental import pallas as pl
from jax.experimental.pallas import tpu as pltpu


# ----------------------------------------------------------------------------
# Fused Pallas kernel: conv1+bn1+relu -> conv2+bn2 -> (+x) -> relu
# Grid = (N,); each grid step processes one full (D, H, W*C) sample.
# ----------------------------------------------------------------------------
def _make_fused_block_kernel(D, H, W, Cin, Cmid, Cout):
    DH = D * H
    WCi, WCm, WCo = W * Cin, W * Cmid, W * Cout
    PWCi, PWCm = (W + 2) * Cin, (W + 2) * Cmid   # lane-dense padded widths

    def kernel(x_ref, w1_ref, s1_ref, sh1_ref, w2_ref, s2_ref, sh2_ref,
               out_ref, xpad_ref, hpad_ref):
        cdt = xpad_ref.dtype                      # matmul/staging compute dtype

        # ---- zero ONLY the 6 halo faces (interior is fully overwritten below).
        xpad_ref[0, :, :] = jnp.zeros((H + 2, PWCi), cdt)
        xpad_ref[D + 1, :, :] = jnp.zeros((H + 2, PWCi), cdt)
        xpad_ref[1:D + 1, 0, :] = jnp.zeros((D, PWCi), cdt)
        xpad_ref[1:D + 1, H + 1, :] = jnp.zeros((D, PWCi), cdt)
        xpad_ref[1:D + 1, 1:H + 1, 0:Cin] = jnp.zeros((D, H, Cin), cdt)
        xpad_ref[1:D + 1, 1:H + 1, (W + 1) * Cin:(W + 2) * Cin] = (
            jnp.zeros((D, H, Cin), cdt))

        hpad_ref[0, :, :] = jnp.zeros((H + 2, PWCm), cdt)
        hpad_ref[D + 1, :, :] = jnp.zeros((H + 2, PWCm), cdt)
        hpad_ref[1:D + 1, 0, :] = jnp.zeros((D, PWCm), cdt)
        hpad_ref[1:D + 1, H + 1, :] = jnp.zeros((D, PWCm), cdt)
        hpad_ref[1:D + 1, 1:H + 1, 0:Cmid] = jnp.zeros((D, H, Cmid), cdt)
        hpad_ref[1:D + 1, 1:H + 1, (W + 1) * Cmid:(W + 2) * Cmid] = (
            jnp.zeros((D, H, Cmid), cdt))

        # ---- stage x (already lane-dense (D, H, W*Cin)) into the padded
        # interior: a straight store, no reshape / relayout.
        x = x_ref[...]                                           # (D, H, W*Cin)
        xpad_ref[1:D + 1, 1:H + 1, Cin:(W + 1) * Cin] = x.astype(cdt)

        # ---- conv1: 9 accumulating banded matmuls (one per (kd, kh)).
        # LHS reshape (D, H, PWCi) -> (D*H, PWCi) collapses leading sublane
        # dims only; the lane dim is untouched (no relayout).
        acc1 = jnp.zeros((DH, WCm), jnp.float32)
        for kd in range(3):
            for kh in range(3):
                a = xpad_ref[kd:kd + D, kh:kh + H, :].reshape(DH, PWCi)
                acc1 = acc1 + jnp.dot(a, w1_ref[kd * 3 + kh],
                                      preferred_element_type=jnp.float32)

        # Folded conv-bias + eval-mode BatchNorm affine + ReLU, in f32.
        h = jnp.maximum(acc1 * s1_ref[...] + sh1_ref[...], 0.0)   # (DH, W*Cmid)

        # ---- write conv1 epilogue straight into the hpad interior (leading-dim
        # split only; h never round-trips through another layout or HBM).
        hpad_ref[1:D + 1, 1:H + 1, Cmid:(W + 1) * Cmid] = (
            h.reshape(D, H, WCm).astype(cdt))

        # ---- conv2: same structure.
        acc2 = jnp.zeros((DH, WCo), jnp.float32)
        for kd in range(3):
            for kh in range(3):
                a = hpad_ref[kd:kd + D, kh:kh + H, :].reshape(DH, PWCm)
                acc2 = acc2 + jnp.dot(a, w2_ref[kd * 3 + kh],
                                      preferred_element_type=jnp.float32)
        y = acc2 * s2_ref[...] + sh2_ref[...]

        # ---- residual (uses x directly, as in the PyTorch forward) + ReLU.
        # Reuses the x block already in registers/VMEM; (D,H,W*C)->(D*H,W*C) is
        # a pure leading-dim collapse (no relayout), so no second x DMA needed.
        res = x.reshape(DH, WCi).astype(jnp.float32)
        out_ref[...] = jnp.maximum(y + res, 0.0).astype(out_ref.dtype)

    return kernel


# ----------------------------------------------------------------------------
# Wrapper helpers
# ----------------------------------------------------------------------------
def _fold_bias_bn(bias, gamma, beta, mean, var, eps):
    scale = gamma / jnp.sqrt(var + eps)
    shift = beta + (bias - mean) * scale
    return scale.astype(jnp.float32), shift.astype(jnp.float32)   # (C,)


def _banded_weights(w, W, dtype):
    """(3,3,3,Cin,Cout) conv weight -> (9, (W+2)*Cin, W*Cout) block-Toeplitz.

    For tap-pair t = kd*3+kh, B[t] realizes the 3 kw taps of a 1-D conv along
    the lane-dense (padded-w, cin) axis:
        B[t][(w+kw)*Cin + ci, w*Cout + co] = w[kd, kh, kw, ci, co].
    Built on the host/XLA side (tiny); zeros elsewhere are the accepted MXU
    waste that buys a relayout-free kernel body.
    """
    _, _, _, Cin, Cout = w.shape
    mats = []
    for kd in range(3):
        for kh in range(3):
            strip = w[kd, kh].reshape(3 * Cin, Cout)          # (3*Cin, Cout)
            cols = []
            for ww in range(W):
                cols.append(jnp.pad(strip,
                                    ((ww * Cin, (W - 1 - ww) * Cin), (0, 0))))
            mats.append(jnp.concatenate(cols, axis=1))        # ((W+2)Cin, W*Cout)
    return jnp.stack(mats, axis=0).astype(dtype)


def _vmem_limit_bytes():
    # Per-generation sizing: ~75% of physical VMEM (v5e/v6e: 128 MiB -> ~96 MiB,
    # v7x: 64 MiB -> ~48 MiB), capped for safety.
    try:
        cap = pltpu.get_tpu_info().vmem_capacity_bytes
    except Exception:
        cap = 64 * 1024 * 1024
    return int(min(cap * 3 // 4, 100 * 1024 * 1024))


@functools.partial(jax.jit, static_argnames=("compute_dtype",))
def restnet_basicblock_3d_forward(x, params, compute_dtype=jnp.float32):
    """x: (N, D, H, W, C) NDHWC, C == in_channels == out_channels."""
    N, D, H, W, Cin = x.shape
    Cout = params["w1"].shape[-1]
    Cmid = Cout
    assert Cin == Cout, "residual (x + out) requires in_channels == out_channels"
    DH = D * H

    # Block-Toeplitz ("banded") weights; bf16 staging is fine on v5e too (its
    # MXU is bf16-native); the epilogue stays f32 regardless.
    w1b = _banded_weights(params["w1"], W, compute_dtype)   # (9,(W+2)Cin, W*Cmid)
    w2b = _banded_weights(params["w2"], W, compute_dtype)   # (9,(W+2)Cmid,W*Cout)

    s1, sh1 = _fold_bias_bn(params["b1"], params["g1"], params["be1"],
                            params["m1"], params["v1"], params["eps"])
    s2, sh2 = _fold_bias_bn(params["b2"], params["g2"], params["be2"],
                            params["m2"], params["v2"], params["eps"])
    # Tile per-channel affine to the lane-dense (w, c) layout.
    s1t, sh1t = jnp.tile(s1, W)[None, :], jnp.tile(sh1, W)[None, :]   # (1, W*Cmid)
    s2t, sh2t = jnp.tile(s2, W)[None, :], jnp.tile(sh2, W)[None, :]   # (1, W*Cout)

    # Free HBM metadata reshape: fold channels into the lane dim.
    x_lane = x.reshape(N, D, H, W * Cin)

    kernel = _make_fused_block_kernel(D, H, W, Cin, Cmid, Cout)

    grid_spec = pltpu.PrefetchScalarGridSpec(
        num_scalar_prefetch=0,
        grid=(N,),
        in_specs=[
            pl.BlockSpec((None, D, H, W * Cin), lambda n: (n, 0, 0, 0)),
            pl.BlockSpec((9, (W + 2) * Cin, W * Cmid), lambda n: (0, 0, 0)),
            pl.BlockSpec((1, W * Cmid), lambda n: (0, 0)),
            pl.BlockSpec((1, W * Cmid), lambda n: (0, 0)),
            pl.BlockSpec((9, (W + 2) * Cmid, W * Cout), lambda n: (0, 0, 0)),
            pl.BlockSpec((1, W * Cout), lambda n: (0, 0)),
            pl.BlockSpec((1, W * Cout), lambda n: (0, 0)),
        ],
        # Lane-dense (D*H, W*Cout) output slab; wrapper reshape back is free.
        out_specs=pl.BlockSpec((None, DH, W * Cout), lambda n: (n, 0, 0)),
        scratch_shapes=[
            pltpu.VMEM((D + 2, H + 2, (W + 2) * Cin), compute_dtype),   # xpad
            pltpu.VMEM((D + 2, H + 2, (W + 2) * Cmid), compute_dtype),  # hpad
        ],
    )

    out_flat = pl.pallas_call(
        kernel,
        out_shape=jax.ShapeDtypeStruct((N, DH, W * Cout), x.dtype),
        grid_spec=grid_spec,
        compiler_params=pltpu.CompilerParams(
            # Batch axis is independent -> shard across TensorCores (2x on v7x).
            dimension_semantics=("parallel",),
            vmem_limit_bytes=_vmem_limit_bytes(),
        ),
    )(x_lane, w1b, s1t, sh1t, w2b, s2t, sh2t)

    return out_flat.reshape(N, D, H, W, Cout)


# ----------------------------------------------------------------------------
# Parameter init (eval-mode BatchNorm semantics with running stats)
# ----------------------------------------------------------------------------
def init_params(key, in_channels, out_channels):
    ks = jax.random.split(key, 10)
    p = {}
    # Conv weights generated directly in (kd, kh, kw, Cin, Cout) layout.
    p["w1"] = jax.random.normal(ks[0], (3, 3, 3, in_channels, out_channels),
                                jnp.float32) * 0.1
    p["b1"] = jax.random.normal(ks[1], (out_channels,), jnp.float32) * 0.1
    p["w2"] = jax.random.normal(ks[2], (3, 3, 3, out_channels, out_channels),
                                jnp.float32) * 0.1
    p["b2"] = jax.random.normal(ks[3], (out_channels,), jnp.float32) * 0.1
    p["g1"] = 1.0 + 0.1 * jax.random.normal(ks[4], (out_channels,), jnp.float32)
    p["be1"] = 0.1 * jax.random.normal(ks[5], (out_channels,), jnp.float32)
    p["m1"] = 0.1 * jax.random.normal(ks[6], (out_channels,), jnp.float32)
    p["v1"] = jnp.abs(jax.random.normal(ks[7], (out_channels,), jnp.float32)) + 0.5
    p["g2"] = 1.0 + 0.1 * jax.random.normal(ks[8], (out_channels,), jnp.float32)
    p["be2"] = 0.1 * jax.random.normal(ks[9], (out_channels,), jnp.float32)
    p["m2"] = jnp.zeros((out_channels,), jnp.float32)
    p["v2"] = jnp.ones((out_channels,), jnp.float32)
    p["eps"] = 1e-5
    return p


# ----------------------------------------------------------------------------
# Pure-JAX reference (for correctness check)
# ----------------------------------------------------------------------------
def _conv_bn_ref(x, w, bias, gamma, beta, mean, var, eps):
    y = lax.conv_general_dilated(
        x, w, window_strides=(1, 1, 1),
        padding=((1, 1), (1, 1), (1, 1)),
        dimension_numbers=("NDHWC", "DHWIO", "NDHWC"),
    )
    y = y + bias
    return (y - mean) / jnp.sqrt(var + eps) * gamma + beta


def reference_forward(x, p):
    h = jax.nn.relu(_conv_bn_ref(x, p["w1"], p["b1"], p["g1"], p["be1"],
                                 p["m1"], p["v1"], p["eps"]))
    out = _conv_bn_ref(h, p["w2"], p["b2"], p["g2"], p["be2"],
                       p["m2"], p["v2"], p["eps"])
    return jax.nn.relu(x + out)


# ----------------------------------------------------------------------------
if __name__ == "__main__":
    import numpy as np

    # Small shapes: batch=2, channels=4, D=H=W=8.
    # (in_channels must equal out_channels since forward adds x directly.)
    N, C, D, H, W = 2, 4, 8, 8, 8

    key = jax.random.PRNGKey(0)
    kx, kp = jax.random.split(key)
    x = jax.random.normal(kx, (N, D, H, W, C), jnp.float32)  # NDHWC
    params = init_params(kp, C, C)

    # f32 matmul path: must match the pure-JAX reference tightly (this is the
    # real indexing/layout correctness gate).
    out = jax.block_until_ready(restnet_basicblock_3d_forward(x, params))
    ref = jax.block_until_ready(reference_forward(x, params))
    np.testing.assert_allclose(np.asarray(out), np.asarray(ref),
                               rtol=1e-3, atol=1e-3)

    # bf16 staging/matmul path (works on v5e/v6e/v7x; f32 accumulation).
    # Tolerance is loose by necessity of bf16; layout bugs are caught by the
    # tight f32 check above.
    out_bf16 = jax.block_until_ready(
        restnet_basicblock_3d_forward(x, params, compute_dtype=jnp.bfloat16))
    np.testing.assert_allclose(np.asarray(out_bf16), np.asarray(ref),
                               rtol=1e-1, atol=1e-1)

    print("KERNEL_OK")
</pallas_src>

<mosaic_0001>
module attributes {stable_mosaic.version = 11 : i64} {
  func.func @kernel(%arg0: i32, %arg1: memref<1x8x8x32xf32, #tpu.memory_space<vmem>>, %arg2: memref<9x40x32xf32, #tpu.memory_space<vmem>>, %arg3: memref<1x32xf32, #tpu.memory_space<vmem>>, %arg4: memref<1x32xf32, #tpu.memory_space<vmem>>, %arg5: memref<9x40x32xf32, #tpu.memory_space<vmem>>, %arg6: memref<1x32xf32, #tpu.memory_space<vmem>>, %arg7: memref<1x32xf32, #tpu.memory_space<vmem>>, %arg8: memref<1x64x32xf32, #tpu.memory_space<vmem>>, %arg9: memref<10x10x40xf32, #tpu.memory_space<vmem>>, %arg10: memref<10x10x40xf32, #tpu.memory_space<vmem>>) attributes {dimension_semantics = [#tpu.dimension_semantics<parallel>], iteration_bounds = array<i64: 2>, scalar_prefetch = 0 : i64, scratch_operands = 2 : i64, tpu.core_type = #tpu.core_type<tc>, window_params = [{transform_indices = @transform_0, window_bounds = array<i64: 1, 8, 8, 32>}, {pipeline_mode = #tpu.pipeline_mode<synchronous>, transform_indices = @transform_1, window_bounds = array<i64: 9, 40, 32>}, {pipeline_mode = #tpu.pipeline_mode<synchronous>, transform_indices = @transform_2, window_bounds = array<i64: 1, 32>}, {pipeline_mode = #tpu.pipeline_mode<synchronous>, transform_indices = @transform_3, window_bounds = array<i64: 1, 32>}, {pipeline_mode = #tpu.pipeline_mode<synchronous>, transform_indices = @transform_4, window_bounds = array<i64: 9, 40, 32>}, {pipeline_mode = #tpu.pipeline_mode<synchronous>, transform_indices = @transform_5, window_bounds = array<i64: 1, 32>}, {pipeline_mode = #tpu.pipeline_mode<synchronous>, transform_indices = @transform_6, window_bounds = array<i64: 1, 32>}, {transform_indices = @transform_7, window_bounds = array<i64: 1, 64, 32>}]} {
    %cst = arith.constant 0.000000e+00 : f32
    %0 = vector.broadcast %cst : f32 to vector<10x40xf32>
    %c0 = arith.constant 0 : index
    %c0_0 = arith.constant 0 : index
    %c0_1 = arith.constant 0 : index
    %1 = vector.load %arg9[%c0, %c0_0, %c0_1] : memref<10x10x40xf32, #tpu.memory_space<vmem>>, vector<1x10x40xf32>
    %2 = vector.shape_cast %1 : vector<1x10x40xf32> to vector<10x40xf32>
    %3 = vector.shape_cast %0 : vector<10x40xf32> to vector<1x10x40xf32>
    tpu.vector_store %arg9[%c0, %c0_0, %c0_1], %3 {strides = array<i32>} : memref<10x10x40xf32, #tpu.memory_space<vmem>>, vector<1x10x40xf32>,
    %cst_2 = arith.constant 0.000000e+00 : f32
    %4 = vector.broadcast %cst_2 : f32 to vector<10x40xf32>
    %c9 = arith.constant 9 : index
    %c0_3 = arith.constant 0 : index
    %c0_4 = arith.constant 0 : index
    %5 = vector.load %arg9[%c9, %c0_3, %c0_4] : memref<10x10x40xf32, #tpu.memory_space<vmem>>, vector<1x10x40xf32>
    %6 = vector.shape_cast %5 : vector<1x10x40xf32> to vector<10x40xf32>
    %7 = vector.shape_cast %4 : vector<10x40xf32> to vector<1x10x40xf32>
    tpu.vector_store %arg9[%c9, %c0_3, %c0_4], %7 {strides = array<i32>} : memref<10x10x40xf32, #tpu.memory_space<vmem>>, vector<1x10x40xf32>,
    %cst_5 = arith.constant 0.000000e+00 : f32
    %8 = vector.broadcast %cst_5 : f32 to vector<8x40xf32>
    %c1 = arith.constant 1 : index
    %c0_6 = arith.constant 0 : index
    %c0_7 = arith.constant 0 : index
    %9 = vector.load %arg9[%c1, %c0_6, %c0_7] : memref<10x10x40xf32, #tpu.memory_space<vmem>>, vector<8x1x40xf32>
    %10 = vector.shape_cast %9 : vector<8x1x40xf32> to vector<8x40xf32>
    %11 = vector.shape_cast %8 : vector<8x40xf32> to vector<8x1x40xf32>
    tpu.vector_store %arg9[%c1, %c0_6, %c0_7], %11 {strides = array<i32>} : memref<10x10x40xf32, #tpu.memory_space<vmem>>, vector<8x1x40xf32>,
    %cst_8 = arith.constant 0.000000e+00 : f32
    %12 = vector.broadcast %cst_8 : f32 to vector<8x40xf32>
    %c1_9 = arith.constant 1 : index
    %c9_10 = arith.constant 9 : index
    %c0_11 = arith.constant 0 : index
    %13 = vector.load %arg9[%c1_9, %c9_10, %c0_11] : memref<10x10x40xf32, #tpu.memory_space<vmem>>, vector<8x1x40xf32>
    %14 = vector.shape_cast %13 : vector<8x1x40xf32> to vector<8x40xf32>
    %15 = vector.shape_cast %12 : vector<8x40xf32> to vector<8x1x40xf32>
    tpu.vector_store %arg9[%c1_9, %c9_10, %c0_11], %15 {strides = array<i32>} : memref<10x10x40xf32, #tpu.memory_space<vmem>>, vector<8x1x40xf32>,
    %cst_12 = arith.constant 0.000000e+00 : f32
    %16 = vector.broadcast %cst_12 : f32 to vector<8x8x4xf32>
    %c1_13 = arith.constant 1 : index
    %c1_14 = arith.constant 1 : index
    %c0_15 = arith.constant 0 : index
    %17 = vector.load %arg9[%c1_13, %c1_14, %c0_15] : memref<10x10x40xf32, #tpu.memory_space<vmem>>, vector<8x8x4xf32>
    tpu.vector_store %arg9[%c1_13, %c1_14, %c0_15], %16 {strides = array<i32>} : memref<10x10x40xf32, #tpu.memory_space<vmem>>, vector<8x8x4xf32>,
    %cst_16 = arith.constant 0.000000e+00 : f32
    %18 = vector.broadcast %cst_16 : f32 to vector<8x8x4xf32>
    %c1_17 = arith.constant 1 : index
    %c1_18 = arith.constant 1 : index
    %c36 = arith.constant 36 : index
    %19 = vector.load %arg9[%c1_17, %c1_18, %c36] : memref<10x10x40xf32, #tpu.memory_space<vmem>>, vector<8x8x4xf32>
    tpu.vector_store %arg9[%c1_17, %c1_18, %c36], %18 {strides = array<i32>} : memref<10x10x40xf32, #tpu.memory_space<vmem>>, vector<8x8x4xf32>,
    %cst_19 = arith.constant 0.000000e+00 : f32
    %20 = vector.broadcast %cst_19 : f32 to vector<10x40xf32>
    %c0_20 = arith.constant 0 : index
    %c0_21 = arith.constant 0 : index
    %c0_22 = arith.constant 0 : index
    %21 = vector.load %arg10[%c0_20, %c0_21, %c0_22] : memref<10x10x40xf32, #tpu.memory_space<vmem>>, vector<1x10x40xf32>
    %22 = vector.shape_cast %21 : vector<1x10x40xf32> to vector<10x40xf32>
    %23 = vector.shape_cast %20 : vector<10x40xf32> to vector<1x10x40xf32>
    tpu.vector_store %arg10[%c0_20, %c0_21, %c0_22], %23 {strides = array<i32>} : memref<10x10x40xf32, #tpu.memory_space<vmem>>, vector<1x10x40xf32>,
    %cst_23 = arith.constant 0.000000e+00 : f32
    %24 = vector.broadcast %cst_23 : f32 to vector<10x40xf32>
    %c9_24 = arith.constant 9 : index
    %c0_25 = arith.constant 0 : index
    %c0_26 = arith.constant 0 : index
    %25 = vector.load %arg10[%c9_24, %c0_25, %c0_26] : memref<10x10x40xf32, #tpu.memory_space<vmem>>, vector<1x10x40xf32>
    %26 = vector.shape_cast %25 : vector<1x10x40xf32> to vector<10x40xf32>
    %27 = vector.shape_cast %24 : vector<10x40xf32> to vector<1x10x40xf32>
    tpu.vector_store %arg10[%c9_24, %c0_25, %c0_26], %27 {strides = array<i32>} : memref<10x10x40xf32, #tpu.memory_space<vmem>>, vector<1x10x40xf32>,
    %cst_27 = arith.constant 0.000000e+00 : f32
    %28 = vector.broadcast %cst_27 : f32 to vector<8x40xf32>
    %c1_28 = arith.constant 1 : index
    %c0_29 = arith.constant 0 : index
    %c0_30 = arith.constant 0 : index
    %29 = vector.load %arg10[%c1_28, %c0_29, %c0_30] : memref<10x10x40xf32, #tpu.memory_space<vmem>>, vector<8x1x40xf32>
    %30 = vector.shape_cast %29 : vector<8x1x40xf32> to vector<8x40xf32>
    %31 = vector.shape_cast %28 : vector<8x40xf32> to vector<8x1x40xf32>
    tpu.vector_store %arg10[%c1_28, %c0_29, %c0_30], %31 {strides = array<i32>} : memref<10x10x40xf32, #tpu.memory_space<vmem>>, vector<8x1x40xf32>,
    %cst_31 = arith.constant 0.000000e+00 : f32
    %32 = vector.broadcast %cst_31 : f32 to vector<8x40xf32>
    %c1_32 = arith.constant 1 : index
    %c9_33 = arith.constant 9 : index
    %c0_34 = arith.constant 0 : index
    %33 = vector.load %arg10[%c1_32, %c9_33, %c0_34] : memref<10x10x40xf32, #tpu.memory_space<vmem>>, vector<8x1x40xf32>
    %34 = vector.shape_cast %33 : vector<8x1x40xf32> to vector<8x40xf32>
    %35 = vector.shape_cast %32 : vector<8x40xf32> to vector<8x1x40xf32>
    tpu.vector_store %arg10[%c1_32, %c9_33, %c0_34], %35 {strides = array<i32>} : memref<10x10x40xf32, #tpu.memory_space<vmem>>, vector<8x1x40xf32>,
    %cst_35 = arith.constant 0.000000e+00 : f32
    %36 = vector.broadcast %cst_35 : f32 to vector<8x8x4xf32>
    %c1_36 = arith.constant 1 : index
    %c1_37 = arith.constant 1 : index
    %c0_38 = arith.constant 0 : index
    %37 = vector.load %arg10[%c1_36, %c1_37, %c0_38] : memref<10x10x40xf32, #tpu.memory_space<vmem>>, vector<8x8x4xf32>
    tpu.vector_store %arg10[%c1_36, %c1_37, %c0_38], %36 {strides = array<i32>} : memref<10x10x40xf32, #tpu.memory_space<vmem>>, vector<8x8x4xf32>,
    %cst_39 = arith.constant 0.000000e+00 : f32
    %38 = vector.broadcast %cst_39 : f32 to vector<8x8x4xf32>
    %c1_40 = arith.constant 1 : index
    %c1_41 = arith.constant 1 : index
    %c36_42 = arith.constant 36 : index
    %39 = vector.load %arg10[%c1_40, %c1_41, %c36_42] : memref<10x10x40xf32, #tpu.memory_space<vmem>>, vector<8x8x4xf32>
    tpu.vector_store %arg10[%c1_40, %c1_41, %c36_42], %38 {strides = array<i32>} : memref<10x10x40xf32, #tpu.memory_space<vmem>>, vector<8x8x4xf32>,
    %c0_43 = arith.constant 0 : index
    %c0_44 = arith.constant 0 : index
    %c0_45 = arith.constant 0 : index
    %c0_46 = arith.constant 0 : index
    %40 = vector.load %arg1[%c0_43, %c0_44, %c0_45, %c0_46] : memref<1x8x8x32xf32, #tpu.memory_space<vmem>>, vector<1x8x8x32xf32>
    %41 = vector.shape_cast %40 : vector<1x8x8x32xf32> to vector<8x8x32xf32>
    %c1_47 = arith.constant 1 : index
    %c1_48 = arith.constant 1 : index
    %c4 = arith.constant 4 : index
    %42 = vector.load %arg9[%c1_47, %c1_48, %c4] : memref<10x10x40xf32, #tpu.memory_space<vmem>>, vector<8x8x32xf32>
    tpu.vector_store %arg9[%c1_47, %c1_48, %c4], %41 {strides = array<i32>} : memref<10x10x40xf32, #tpu.memory_space<vmem>>, vector<8x8x32xf32>,
    %cst_49 = arith.constant 0.000000e+00 : f32
    %43 = vector.broadcast %cst_49 : f32 to vector<64x32xf32>
    %c0_50 = arith.constant 0 : index
    %c0_51 = arith.constant 0 : index
    %c0_52 = arith.constant 0 : index
    %44 = vector.load %arg9[%c0_50, %c0_51, %c0_52] : memref<10x10x40xf32, #tpu.memory_space<vmem>>, vector<8x8x40xf32>
    %45 = vector.shape_cast %44 : vector<8x8x40xf32> to vector<64x40xf32>
    %c0_53 = arith.constant 0 : index
    %c0_54 = arith.constant 0 : index
    %c0_55 = arith.constant 0 : index
    %46 = vector.load %arg2[%c0_53, %c0_54, %c0_55] : memref<9x40x32xf32, #tpu.memory_space<vmem>>, vector<1x40x32xf32>
    %47 = vector.shape_cast %46 : vector<1x40x32xf32> to vector<40x32xf32>
    %cst_56 = arith.constant dense<0.000000e+00> : vector<64x32xf32>
    %48 = tpu.matmul %45, %47, %cst_56 {dimension_numbers = #tpu.dot_dimension_numbers<[1], [0], [0], [1], [0, 0, 1, 1], [], []>} : vector<64x40xf32>, vector<40x32xf32>, vector<64x32xf32> -> vector<64x32xf32>
    %49 = arith.addf %43, %48 : vector<64x32xf32>
    %c0_57 = arith.constant 0 : index
    %c1_58 = arith.constant 1 : index
    %c0_59 = arith.constant 0 : index
    %50 = vector.load %arg9[%c0_57, %c1_58, %c0_59] : memref<10x10x40xf32, #tpu.memory_space<vmem>>, vector<8x8x40xf32>
    %51 = vector.shape_cast %50 : vector<8x8x40xf32> to vector<64x40xf32>
    %c1_60 = arith.constant 1 : index
    %c0_61 = arith.constant 0 : index
    %c0_62 = arith.constant 0 : index
    %52 = vector.load %arg2[%c1_60, %c0_61, %c0_62] : memref<9x40x32xf32, #tpu.memory_space<vmem>>, vector<1x40x32xf32>
    %53 = vector.shape_cast %52 : vector<1x40x32xf32> to vector<40x32xf32>
    %cst_63 = arith.constant dense<0.000000e+00> : vector<64x32xf32>
    %54 = tpu.matmul %51, %53, %cst_63 {dimension_numbers = #tpu.dot_dimension_numbers<[1], [0], [0], [1], [0, 0, 1, 1], [], []>} : vector<64x40xf32>, vector<40x32xf32>, vector<64x32xf32> -> vector<64x32xf32>
    %55 = arith.addf %49, %54 : vector<64x32xf32>
    %c0_64 = arith.constant 0 : index
    %c2 = arith.constant 2 : index
    %c0_65 = arith.constant 0 : index
    %56 = vector.load %arg9[%c0_64, %c2, %c0_65] : memref<10x10x40xf32, #tpu.memory_space<vmem>>, vector<8x8x40xf32>
    %57 = vector.shape_cast %56 : vector<8x8x40xf32> to vector<64x40xf32>
    %c2_66 = arith.constant 2 : index
    %c0_67 = arith.constant 0 : index
    %c0_68 = arith.constant 0 : index
    %58 = vector.load %arg2[%c2_66, %c0_67, %c0_68] : memref<9x40x32xf32, #tpu.memory_space<vmem>>, vector<1x40x32xf32>
    %59 = vector.shape_cast %58 : vector<1x40x32xf32> to vector<40x32xf32>
    %cst_69 = arith.constant dense<0.000000e+00> : vector<64x32xf32>
    %60 = tpu.matmul %57, %59, %cst_69 {dimension_numbers = #tpu.dot_dimension_numbers<[1], [0], [0], [1], [0, 0, 1, 1], [], []>} : vector<64x40xf32>, vector<40x32xf32>, vector<64x32xf32> -> vector<64x32xf32>
    %61 = arith.addf %55, %60 : vector<64x32xf32>
    %c1_70 = arith.constant 1 : index
    %c0_71 = arith.constant 0 : index
    %c0_72 = arith.constant 0 : index
    %62 = vector.load %arg9[%c1_70, %c0_71, %c0_72] : memref<10x10x40xf32, #tpu.memory_space<vmem>>, vector<8x8x40xf32>
    %63 = vector.shape_cast %62 : vector<8x8x40xf32> to vector<64x40xf32>
    %c3 = arith.constant 3 : index
    %c0_73 = arith.constant 0 : index
    %c0_74 = arith.constant 0 : index
    %64 = vector.load %arg2[%c3, %c0_73, %c0_74] : memref<9x40x32xf32, #tpu.memory_space<vmem>>, vector<1x40x32xf32>
    %65 = vector.shape_cast %64 : vector<1x40x32xf32> to vector<40x32xf32>
    %cst_75 = arith.constant dense<0.000000e+00> : vector<64x32xf32>
    %66 = tpu.matmul %63, %65, %cst_75 {dimension_numbers = #tpu.dot_dimension_numbers<[1], [0], [0], [1], [0, 0, 1, 1], [], []>} : vector<64x40xf32>, vector<40x32xf32>, vector<64x32xf32> -> vector<64x32xf32>
    %67 = arith.addf %61, %66 : vector<64x32xf32>
    %c1_76 = arith.constant 1 : index
    %c1_77 = arith.constant 1 : index
    %c0_78 = arith.constant 0 : index
    %68 = vector.load %arg9[%c1_76, %c1_77, %c0_78] : memref<10x10x40xf32, #tpu.memory_space<vmem>>, vector<8x8x40xf32>
    %69 = vector.shape_cast %68 : vector<8x8x40xf32> to vector<64x40xf32>
    %c4_79 = arith.constant 4 : index
    %c0_80 = arith.constant 0 : index
    %c0_81 = arith.constant 0 : index
    %70 = vector.load %arg2[%c4_79, %c0_80, %c0_81] : memref<9x40x32xf32, #tpu.memory_space<vmem>>, vector<1x40x32xf32>
    %71 = vector.shape_cast %70 : vector<1x40x32xf32> to vector<40x32xf32>
    %cst_82 = arith.constant dense<0.000000e+00> : vector<64x32xf32>
    %72 = tpu.matmul %69, %71, %cst_82 {dimension_numbers = #tpu.dot_dimension_numbers<[1], [0], [0], [1], [0, 0, 1, 1], [], []>} : vector<64x40xf32>, vector<40x32xf32>, vector<64x32xf32> -> vector<64x32xf32>
    %73 = arith.addf %67, %72 : vector<64x32xf32>
    %c1_83 = arith.constant 1 : index
    %c2_84 = arith.constant 2 : index
    %c0_85 = arith.constant 0 : index
    %74 = vector.load %arg9[%c1_83, %c2_84, %c0_85] : memref<10x10x40xf32, #tpu.memory_space<vmem>>, vector<8x8x40xf32>
    %75 = vector.shape_cast %74 : vector<8x8x40xf32> to vector<64x40xf32>
    %c5 = arith.constant 5 : index
    %c0_86 = arith.constant 0 : index
    %c0_87 = arith.constant 0 : index
    %76 = vector.load %arg2[%c5, %c0_86, %c0_87] : memref<9x40x32xf32, #tpu.memory_space<vmem>>, vector<1x40x32xf32>
    %77 = vector.shape_cast %76 : vector<1x40x32xf32> to vector<40x32xf32>
    %cst_88 = arith.constant dense<0.000000e+00> : vector<64x32xf32>
    %78 = tpu.matmul %75, %77, %cst_88 {dimension_numbers = #tpu.dot_dimension_numbers<[1], [0], [0], [1], [0, 0, 1, 1], [], []>} : vector<64x40xf32>, vector<40x32xf32>, vector<64x32xf32> -> vector<64x32xf32>
    %79 = arith.addf %73, %78 : vector<64x32xf32>
    %c2_89 = arith.constant 2 : index
    %c0_90 = arith.constant 0 : index
    %c0_91 = arith.constant 0 : index
    %80 = vector.load %arg9[%c2_89, %c0_90, %c0_91] : memref<10x10x40xf32, #tpu.memory_space<vmem>>, vector<8x8x40xf32>
    %81 = vector.shape_cast %80 : vector<8x8x40xf32> to vector<64x40xf32>
    %c6 = arith.constant 6 : index
    %c0_92 = arith.constant 0 : index
    %c0_93 = arith.constant 0 : index
    %82 = vector.load %arg2[%c6, %c0_92, %c0_93] : memref<9x40x32xf32, #tpu.memory_space<vmem>>, vector<1x40x32xf32>
    %83 = vector.shape_cast %82 : vector<1x40x32xf32> to vector<40x32xf32>
    %cst_94 = arith.constant dense<0.000000e+00> : vector<64x32xf32>
    %84 = tpu.matmul %81, %83, %cst_94 {dimension_numbers = #tpu.dot_dimension_numbers<[1], [0], [0], [1], [0, 0, 1, 1], [], []>} : vector<64x40xf32>, vector<40x32xf32>, vector<64x32xf32> -> vector<64x32xf32>
    %85 = arith.addf %79, %84 : vector<64x32xf32>
    %c2_95 = arith.constant 2 : index
    %c1_96 = arith.constant 1 : index
    %c0_97 = arith.constant 0 : index
    %86 = vector.load %arg9[%c2_95, %c1_96, %c0_97] : memref<10x10x40xf32, #tpu.memory_space<vmem>>, vector<8x8x40xf32>
    %87 = vector.shape_cast %86 : vector<8x8x40xf32> to vector<64x40xf32>
    %c7 = arith.constant 7 : index
    %c0_98 = arith.constant 0 : index
    %c0_99 = arith.constant 0 : index
    %88 = vector.load %arg2[%c7, %c0_98, %c0_99] : memref<9x40x32xf32, #tpu.memory_space<vmem>>, vector<1x40x32xf32>
    %89 = vector.shape_cast %88 : vector<1x40x32xf32> to vector<40x32xf32>
    %cst_100 = arith.constant dense<0.000000e+00> : vector<64x32xf32>
    %90 = tpu.matmul %87, %89, %cst_100 {dimension_numbers = #tpu.dot_dimension_numbers<[1], [0], [0], [1], [0, 0, 1, 1], [], []>} : vector<64x40xf32>, vector<40x32xf32>, vector<64x32xf32> -> vector<64x32xf32>
    %91 = arith.addf %85, %90 : vector<64x32xf32>
    %c2_101 = arith.constant 2 : index
    %c2_102 = arith.constant 2 : index
    %c0_103 = arith.constant 0 : index
    %92 = vector.load %arg9[%c2_101, %c2_102, %c0_103] : memref<10x10x40xf32, #tpu.memory_space<vmem>>, vector<8x8x40xf32>
    %93 = vector.shape_cast %92 : vector<8x8x40xf32> to vector<64x40xf32>
    %c8 = arith.constant 8 : index
    %c0_104 = arith.constant 0 : index
    %c0_105 = arith.constant 0 : index
    %94 = vector.load %arg2[%c8, %c0_104, %c0_105] : memref<9x40x32xf32, #tpu.memory_space<vmem>>, vector<1x40x32xf32>
    %95 = vector.shape_cast %94 : vector<1x40x32xf32> to vector<40x32xf32>
    %cst_106 = arith.constant dense<0.000000e+00> : vector<64x32xf32>
    %96 = tpu.matmul %93, %95, %cst_106 {dimension_numbers = #tpu.dot_dimension_numbers<[1], [0], [0], [1], [0, 0, 1, 1], [], []>} : vector<64x40xf32>, vector<40x32xf32>, vector<64x32xf32> -> vector<64x32xf32>
    %97 = arith.addf %91, %96 : vector<64x32xf32>
    %c0_107 = arith.constant 0 : index
    %c0_108 = arith.constant 0 : index
    %98 = vector.load %arg3[%c0_107, %c0_108] : memref<1x32xf32, #tpu.memory_space<vmem>>, vector<1x32xf32>
    %99 = vector.broadcast %98 : vector<1x32xf32> to vector<64x32xf32>
    %100 = arith.mulf %97, %99 : vector<64x32xf32>
    %c0_109 = arith.constant 0 : index
    %c0_110 = arith.constant 0 : index
    %101 = vector.load %arg4[%c0_109, %c0_110] : memref<1x32xf32, #tpu.memory_space<vmem>>, vector<1x32xf32>
    %102 = vector.broadcast %101 : vector<1x32xf32> to vector<64x32xf32>
    %103 = arith.addf %100, %102 : vector<64x32xf32>
    %cst_111 = arith.constant 0.000000e+00 : f32
    %104 = vector.broadcast %cst_111 : f32 to vector<64x32xf32>
    %105 = arith.maximumf %103, %104 : vector<64x32xf32>
    %106 = vector.shape_cast %105 : vector<64x32xf32> to vector<8x8x32xf32>
    %c1_112 = arith.constant 1 : index
    %c1_113 = arith.constant 1 : index
    %c4_114 = arith.constant 4 : index
    %107 = vector.load %arg10[%c1_112, %c1_113, %c4_114] : memref<10x10x40xf32, #tpu.memory_space<vmem>>, vector<8x8x32xf32>
    tpu.vector_store %arg10[%c1_112, %c1_113, %c4_114], %106 {strides = array<i32>} : memref<10x10x40xf32, #tpu.memory_space<vmem>>, vector<8x8x32xf32>,
    %cst_115 = arith.constant 0.000000e+00 : f32
    %108 = vector.broadcast %cst_115 : f32 to vector<64x32xf32>
    %c0_116 = arith.constant 0 : index
    %c0_117 = arith.constant 0 : index
    %c0_118 = arith.constant 0 : index
    %109 = vector.load %arg10[%c0_116, %c0_117, %c0_118] : memref<10x10x40xf32, #tpu.memory_space<vmem>>, vector<8x8x40xf32>
    %110 = vector.shape_cast %109 : vector<8x8x40xf32> to vector<64x40xf32>
    %c0_119 = arith.constant 0 : index
    %c0_120 = arith.constant 0 : index
    %c0_121 = arith.constant 0 : index
    %111 = vector.load %arg5[%c0_119, %c0_120, %c0_121] : memref<9x40x32xf32, #tpu.memory_space<vmem>>, vector<1x40x32xf32>
    %112 = vector.shape_cast %111 : vector<1x40x32xf32> to vector<40x32xf32>
    %cst_122 = arith.constant dense<0.000000e+00> : vector<64x32xf32>
    %113 = tpu.matmul %110, %112, %cst_122 {dimension_numbers = #tpu.dot_dimension_numbers<[1], [0], [0], [1], [0, 0, 1, 1], [], []>} : vector<64x40xf32>, vector<40x32xf32>, vector<64x32xf32> -> vector<64x32xf32>
    %114 = arith.addf %108, %113 : vector<64x32xf32>
    %c0_123 = arith.constant 0 : index
    %c1_124 = arith.constant 1 : index
    %c0_125 = arith.constant 0 : index
    %115 = vector.load %arg10[%c0_123, %c1_124, %c0_125] : memref<10x10x40xf32, #tpu.memory_space<vmem>>, vector<8x8x40xf32>
    %116 = vector.shape_cast %115 : vector<8x8x40xf32> to vector<64x40xf32>
    %c1_126 = arith.constant 1 : index
    %c0_127 = arith.constant 0 : index
    %c0_128 = arith.constant 0 : index
    %117 = vector.load %arg5[%c1_126, %c0_127, %c0_128] : memref<9x40x32xf32, #tpu.memory_space<vmem>>, vector<1x40x32xf32>
    %118 = vector.shape_cast %117 : vector<1x40x32xf32> to vector<40x32xf32>
    %cst_129 = arith.constant dense<0.000000e+00> : vector<64x32xf32>
    %119 = tpu.matmul %116, %118, %cst_129 {dimension_numbers = #tpu.dot_dimension_numbers<[1], [0], [0], [1], [0, 0, 1, 1], [], []>} : vector<64x40xf32>, vector<40x32xf32>, vector<64x32xf32> -> vector<64x32xf32>
    %120 = arith.addf %114, %119 : vector<64x32xf32>
    %c0_130 = arith.constant 0 : index
    %c2_131 = arith.constant 2 : index
    %c0_132 = arith.constant 0 : index
    %121 = vector.load %arg10[%c0_130, %c2_131, %c0_132] : memref<10x10x40xf32, #tpu.memory_space<vmem>>, vector<8x8x40xf32>
    %122 = vector.shape_cast %121 : vector<8x8x40xf32> to vector<64x40xf32>
    %c2_133 = arith.constant 2 : index
    %c0_134 = arith.constant 0 : index
    %c0_135 = arith.constant 0 : index
    %123 = vector.load %arg5[%c2_133, %c0_134, %c0_135] : memref<9x40x32xf32, #tpu.memory_space<vmem>>, vector<1x40x32xf32>
    %124 = vector.shape_cast %123 : vector<1x40x32xf32> to vector<40x32xf32>
    %cst_136 = arith.constant dense<0.000000e+00> : vector<64x32xf32>
    %125 = tpu.matmul %122, %124, %cst_136 {dimension_numbers = #tpu.dot_dimension_numbers<[1], [0], [0], [1], [0, 0, 1, 1], [], []>} : vector<64x40xf32>, vector<40x32xf32>, vector<64x32xf32> -> vector<64x32xf32>
    %126 = arith.addf %120, %125 : vector<64x32xf32>
    %c1_137 = arith.constant 1 : index
    %c0_138 = arith.constant 0 : index
    %c0_139 = arith.constant 0 : index
    %127 = vector.load %arg10[%c1_137, %c0_138, %c0_139] : memref<10x10x40xf32, #tpu.memory_space<vmem>>, vector<8x8x40xf32>
    %128 = vector.shape_cast %127 : vector<8x8x40xf32> to vector<64x40xf32>
    %c3_140 = arith.constant 3 : index
    %c0_141 = arith.constant 0 : index
    %c0_142 = arith.constant 0 : index
    %129 = vector.load %arg5[%c3_140, %c0_141, %c0_142] : memref<9x40x32xf32, #tpu.memory_space<vmem>>, vector<1x40x32xf32>
    %130 = vector.shape_cast %129 : vector<1x40x32xf32> to vector<40x32xf32>
    %cst_143 = arith.constant dense<0.000000e+00> : vector<64x32xf32>
    %131 = tpu.matmul %128, %130, %cst_143 {dimension_numbers = #tpu.dot_dimension_numbers<[1], [0], [0], [1], [0, 0, 1, 1], [], []>} : vector<64x40xf32>, vector<40x32xf32>, vector<64x32xf32> -> vector<64x32xf32>
    %132 = arith.addf %126, %131 : vector<64x32xf32>
    %c1_144 = arith.constant 1 : index
    %c1_145 = arith.constant 1 : index
    %c0_146 = arith.constant 0 : index
    %133 = vector.load %arg10[%c1_144, %c1_145, %c0_146] : memref<10x10x40xf32, #tpu.memory_space<vmem>>, vector<8x8x40xf32>
    %134 = vector.shape_cast %133 : vector<8x8x40xf32> to vector<64x40xf32>
    %c4_147 = arith.constant 4 : index
    %c0_148 = arith.constant 0 : index
    %c0_149 = arith.constant 0 : index
    %135 = vector.load %arg5[%c4_147, %c0_148, %c0_149] : memref<9x40x32xf32, #tpu.memory_space<vmem>>, vector<1x40x32xf32>
    %136 = vector.shape_cast %135 : vector<1x40x32xf32> to vector<40x32xf32>
    %cst_150 = arith.constant dense<0.000000e+00> : vector<64x32xf32>
    %137 = tpu.matmul %134, %136, %cst_150 {dimension_numbers = #tpu.dot_dimension_numbers<[1], [0], [0], [1], [0, 0, 1, 1], [], []>} : vector<64x40xf32>, vector<40x32xf32>, vector<64x32xf32> -> vector<64x32xf32>
    %138 = arith.addf %132, %137 : vector<64x32xf32>
    %c1_151 = arith.constant 1 : index
    %c2_152 = arith.constant 2 : index
    %c0_153 = arith.constant 0 : index
    %139 = vector.load %arg10[%c1_151, %c2_152, %c0_153] : memref<10x10x40xf32, #tpu.memory_space<vmem>>, vector<8x8x40xf32>
    %140 = vector.shape_cast %139 : vector<8x8x40xf32> to vector<64x40xf32>
    %c5_154 = arith.constant 5 : index
    %c0_155 = arith.constant 0 : index
    %c0_156 = arith.constant 0 : index
    %141 = vector.load %arg5[%c5_154, %c0_155, %c0_156] : memref<9x40x32xf32, #tpu.memory_space<vmem>>, vector<1x40x32xf32>
    %142 = vector.shape_cast %141 : vector<1x40x32xf32> to vector<40x32xf32>
    %cst_157 = arith.constant dense<0.000000e+00> : vector<64x32xf32>
    %143 = tpu.matmul %140, %142, %cst_157 {dimension_numbers = #tpu.dot_dimension_numbers<[1], [0], [0], [1], [0, 0, 1, 1], [], []>} : vector<64x40xf32>, vector<40x32xf32>, vector<64x32xf32> -> vector<64x32xf32>
    %144 = arith.addf %138, %143 : vector<64x32xf32>
    %c2_158 = arith.constant 2 : index
    %c0_159 = arith.constant 0 : index
    %c0_160 = arith.constant 0 : index
    %145 = vector.load %arg10[%c2_158, %c0_159, %c0_160] : memref<10x10x40xf32, #tpu.memory_space<vmem>>, vector<8x8x40xf32>
    %146 = vector.shape_cast %145 : vector<8x8x40xf32> to vector<64x40xf32>
    %c6_161 = arith.constant 6 : index
    %c0_162 = arith.constant 0 : index
    %c0_163 = arith.constant 0 : index
    %147 = vector.load %arg5[%c6_161, %c0_162, %c0_163] : memref<9x40x32xf32, #tpu.memory_space<vmem>>, vector<1x40x32xf32>
    %148 = vector.shape_cast %147 : vector<1x40x32xf32> to vector<40x32xf32>
    %cst_164 = arith.constant dense<0.000000e+00> : vector<64x32xf32>
    %149 = tpu.matmul %146, %148, %cst_164 {dimension_numbers = #tpu.dot_dimension_numbers<[1], [0], [0], [1], [0, 0, 1, 1], [], []>} : vector<64x40xf32>, vector<40x32xf32>, vector<64x32xf32> -> vector<64x32xf32>
    %150 = arith.addf %144, %149 : vector<64x32xf32>
    %c2_165 = arith.constant 2 : index
    %c1_166 = arith.constant 1 : index
    %c0_167 = arith.constant 0 : index
    %151 = vector.load %arg10[%c2_165, %c1_166, %c0_167] : memref<10x10x40xf32, #tpu.memory_space<vmem>>, vector<8x8x40xf32>
    %152 = vector.shape_cast %151 : vector<8x8x40xf32> to vector<64x40xf32>
    %c7_168 = arith.constant 7 : index
    %c0_169 = arith.constant 0 : index
    %c0_170 = arith.constant 0 : index
    %153 = vector.load %arg5[%c7_168, %c0_169, %c0_170] : memref<9x40x32xf32, #tpu.memory_space<vmem>>, vector<1x40x32xf32>
    %154 = vector.shape_cast %153 : vector<1x40x32xf32> to vector<40x32xf32>
    %cst_171 = arith.constant dense<0.000000e+00> : vector<64x32xf32>
    %155 = tpu.matmul %152, %154, %cst_171 {dimension_numbers = #tpu.dot_dimension_numbers<[1], [0], [0], [1], [0, 0, 1, 1], [], []>} : vector<64x40xf32>, vector<40x32xf32>, vector<64x32xf32> -> vector<64x32xf32>
    %156 = arith.addf %150, %155 : vector<64x32xf32>
    %c2_172 = arith.constant 2 : index
    %c2_173 = arith.constant 2 : index
    %c0_174 = arith.constant 0 : index
    %157 = vector.load %arg10[%c2_172, %c2_173, %c0_174] : memref<10x10x40xf32, #tpu.memory_space<vmem>>, vector<8x8x40xf32>
    %158 = vector.shape_cast %157 : vector<8x8x40xf32> to vector<64x40xf32>
    %c8_175 = arith.constant 8 : index
    %c0_176 = arith.constant 0 : index
    %c0_177 = arith.constant 0 : index
    %159 = vector.load %arg5[%c8_175, %c0_176, %c0_177] : memref<9x40x32xf32, #tpu.memory_space<vmem>>, vector<1x40x32xf32>
    %160 = vector.shape_cast %159 : vector<1x40x32xf32> to vector<40x32xf32>
    %cst_178 = arith.constant dense<0.000000e+00> : vector<64x32xf32>
    %161 = tpu.matmul %158, %160, %cst_178 {dimension_numbers = #tpu.dot_dimension_numbers<[1], [0], [0], [1], [0, 0, 1, 1], [], []>} : vector<64x40xf32>, vector<40x32xf32>, vector<64x32xf32> -> vector<64x32xf32>
    %162 = arith.addf %156, %161 : vector<64x32xf32>
    %c0_179 = arith.constant 0 : index
    %c0_180 = arith.constant 0 : index
    %163 = vector.load %arg6[%c0_179, %c0_180] : memref<1x32xf32, #tpu.memory_space<vmem>>, vector<1x32xf32>
    %164 = vector.broadcast %163 : vector<1x32xf32> to vector<64x32xf32>
    %165 = arith.mulf %162, %164 : vector<64x32xf32>
    %c0_181 = arith.constant 0 : index
    %c0_182 = arith.constant 0 : index
    %166 = vector.load %arg7[%c0_181, %c0_182] : memref<1x32xf32, #tpu.memory_space<vmem>>, vector<1x32xf32>
    %167 = vector.broadcast %166 : vector<1x32xf32> to vector<64x32xf32>
    %168 = arith.addf %165, %167 : vector<64x32xf32>
    %169 = vector.shape_cast %41 : vector<8x8x32xf32> to vector<64x32xf32>
    %170 = arith.addf %168, %169 : vector<64x32xf32>
    %cst_183 = arith.constant 0.000000e+00 : f32
    %171 = vector.broadcast %cst_183 : f32 to vector<64x32xf32>
    %172 = arith.maximumf %170, %171 : vector<64x32xf32>
    %c0_184 = arith.constant 0 : index
    %c0_185 = arith.constant 0 : index
    %c0_186 = arith.constant 0 : index
    %173 = vector.load %arg8[%c0_184, %c0_185, %c0_186] : memref<1x64x32xf32, #tpu.memory_space<vmem>>, vector<1x64x32xf32>
    %174 = vector.shape_cast %173 : vector<1x64x32xf32> to vector<64x32xf32>
    %175 = vector.shape_cast %172 : vector<64x32xf32> to vector<1x64x32xf32>
    tpu.vector_store %arg8[%c0_184, %c0_185, %c0_186], %175 {strides = array<i32>} : memref<1x64x32xf32, #tpu.memory_space<vmem>>, vector<1x64x32xf32>,
    return
  }
  func.func @transform_0(%arg0: i32) -> (i32, i32, i32, i32) {
    %c0_i32 = arith.constant 0 : i32
    %c0_i32_0 = arith.constant 0 : i32
    %c0_i32_1 = arith.constant 0 : i32
    %c0_i32_2 = arith.constant 0 : i32
    return %arg0, %c0_i32, %c0_i32_0, %c0_i32_1 : i32, i32, i32, i32
  }
  func.func @transform_1(%arg0: i32) -> (i32, i32, i32) {
    %c0_i32 = arith.constant 0 : i32
    %c0_i32_0 = arith.constant 0 : i32
    %c0_i32_1 = arith.constant 0 : i32
    %c0_i32_2 = arith.constant 0 : i32
    return %c0_i32, %c0_i32_0, %c0_i32_1 : i32, i32, i32
  }
  func.func @transform_2(%arg0: i32) -> (i32, i32) {
    %c0_i32 = arith.constant 0 : i32
    %c0_i32_0 = arith.constant 0 : i32
    %c0_i32_1 = arith.constant 0 : i32
    return %c0_i32, %c0_i32_0 : i32, i32
  }
  func.func @transform_3(%arg0: i32) -> (i32, i32) {
    %c0_i32 = arith.constant 0 : i32
    %c0_i32_0 = arith.constant 0 : i32
    %c0_i32_1 = arith.constant 0 : i32
    return %c0_i32, %c0_i32_0 : i32, i32
  }
  func.func @transform_4(%arg0: i32) -> (i32, i32, i32) {
    %c0_i32 = arith.constant 0 : i32
    %c0_i32_0 = arith.constant 0 : i32
    %c0_i32_1 = arith.constant 0 : i32
    %c0_i32_2 = arith.constant 0 : i32
    return %c0_i32, %c0_i32_0, %c0_i32_1 : i32, i32, i32
  }
  func.func @transform_5(%arg0: i32) -> (i32, i32) {
    %c0_i32 = arith.constant 0 : i32
    %c0_i32_0 = arith.constant 0 : i32
    %c0_i32_1 = arith.constant 0 : i32
    return %c0_i32, %c0_i32_0 : i32, i32
  }
  func.func @transform_6(%arg0: i32) -> (i32, i32) {
    %c0_i32 = arith.constant 0 : i32
    %c0_i32_0 = arith.constant 0 : i32
    %c0_i32_1 = arith.constant 0 : i32
    return %c0_i32, %c0_i32_0 : i32, i32
  }
  func.func @transform_7(%arg0: i32) -> (i32, i32, i32) {
    %c0_i32 = arith.constant 0 : i32
    %c0_i32_0 = arith.constant 0 : i32
    %c0_i32_1 = arith.constant 0 : i32
    return %arg0, %c0_i32, %c0_i32_0 : i32, i32, i32
  }
}

</mosaic_0001>

<bundles_post_ra>
// kernel: tile.23
= control target key start
LH: loop header
LB: loop body
LE: loop exit
PB: predicated region body
PF: predicated region fallthrough
CT: control target
= control target key end

     0   :  { %s22_s0 = inlined_call_operand.vmem [shape: f32[4], index: 0, kind: input, shape index: {}]   ;;  %s23_s1 = inlined_call_operand.vmem [shape: f32[8,4], index: 1, kind: output, shape index: {}]  }
   0x1   :  { %v4_v0 = vld [vmem:[%s22_s0] ss:$0 sm:$0xff] }
   0x2   :  { %5 = vst [vmem:[%s23_s1] sm:$0xff] %v4_v0 }

// kernel: tile.24
= control target key start
LH: loop header
LB: loop body
LE: loop exit
PB: predicated region body
PF: predicated region fallthrough
CT: control target
= control target key end

     0   :  { %s67_s10 = smov 28   ;;  %s68_s11 = smov 20   ;;  %vm3_vm0 = vcmask 31744   ;;  %vm9_vm1 = vcmask 261344   ;;  %vm15_vm2 = vcmask 228544   ;;  %vm21_vm3 = vcmask 195744   ;;  %s111_s0 = inlined_call_operand.vmem [shape: f32[8,4], index: 0, kind: input, shape index: {}]   ;;  %s112_s1 = inlined_call_operand.vmem [shape: f32[1,32], index: 1, kind: output, shape index: {}]  }
   0x1   :  { %v53_v0 = vld [vmem:[%s111_s0 + $0x7] sm:$0x1]   ;;  %v55_v1 = vld [vmem:[%s111_s0 + $0x5] sm:$0x1]   ;;  %v54_v2 = vld [vmem:[%s111_s0 + $0x6] sm:$0x1]  }
   0x2   :  { %7 = vrot.lane.b32.xlu0 %v53_v0, %s67_s10  ;;  %19 = vrot.lane.b32.xlu1 %v55_v1, %s68_s11  ;;  %v56_v3 = vld [vmem:[%s111_s0 + $0x4] sm:$0x1]   ;;  %v2_v4 = vld [vmem:[%s111_s0] sm:$0x1]   ;;  %s69_s18 = smov 24   ;;  %s70_s19 = smov 16  }
   0x3   :  { %4 = vst.msk [vmem:[#allocation0] sm:$0x1] %vm3_vm0, %v2_v4   ;;  %v57_v5 = vld [vmem:[%s111_s0 + $0x3] sm:$0x1]   ;;  %v58_v6 = vld [vmem:[%s111_s0 + $0x2] sm:$0x1]  }
   0x4   :  { %s71_s24 = smov 12   ;;  %s72_s25 = smov 8   ;;  %v59_v7 = vld [vmem:[%s111_s0 + $0x1] sm:$0x1]   ;;  %vm27_vm4 = vcmask 162944   ;;  %vm33_vm5 = vcmask 130144  }
   0x5   :  { %s73_s0 = smov 4   ;;  %vm39_vm6 = vcmask 97344   ;;  %vm45_vm7 = vcmask 64544  }
   0x6   :  { %13 = vrot.lane.b32.xlu0 %v54_v2, %s69_s18  ;;  %25 = vrot.lane.b32.xlu1 %v56_v3, %s70_s19 }
   0xa   :  { %31 = vrot.lane.b32.xlu0 %v57_v5, %s71_s24  ;;  %37 = vrot.lane.b32.xlu1 %v58_v6, %s72_s25 }
   0xe   :  { %43 = vrot.lane.b32.xlu0 %v59_v7, %s73_s0 }
  0x74   :  { %v8_v8 = vpop.permute.xlu0 %7   ;;  %v20_v9 = vpop.permute.xlu1 %19  }
  0x75   :  { %10 = vst.msk [vmem:[#allocation0] sm:$0x1] %vm9_vm1, %v8_v8  }
  0x78   :  { %v14_v10 = vpop.permute.xlu0 %13   ;;  %v26_v11 = vpop.permute.xlu1 %25  }
  0x79   :  { %16 = vst.msk [vmem:[#allocation0] sm:$0x1] %vm15_vm2, %v14_v10  }
  0x7a   :  { %22 = vst.msk [vmem:[#allocation0] sm:$0x1] %vm21_vm3, %v20_v9  }
  0x7b   :  { %28 = vst.msk [vmem:[#allocation0] sm:$0x1] %vm27_vm4, %v26_v11  }
  0x7c   :  { %v32_v12 = vpop.permute.xlu0 %31   ;;  %v38_v13 = vpop.permute.xlu1 %37  }
  0x7d   :  { %34 = vst.msk [vmem:[#allocation0] sm:$0x1] %vm33_vm5, %v32_v12  }
  0x7e   :  { %40 = vst.msk [vmem:[#allocation0] sm:$0x1] %vm39_vm6, %v38_v13  }
  0x80   :  { %v44_v14 = vpop.permute.xlu0 %43  }
  0x81   :  { %46 = vst.msk [vmem:[#allocation0] sm:$0x1] %vm45_vm7, %v44_v14  }
  0x88   :  { %v50_v15 = vld [vmem:[#allocation0] sm:$0x1] }
  0x89   :  { %52 = vst [vmem:[%s112_s1] sm:$0x1] %v50_v15 }

// kernel: restnet_basicblock_3d_forward.1
= control target key start
LH: loop header
LB: loop body
LE: loop exit
PB: predicated region body
PF: predicated region fallthrough
CT: control target
= control target key end

     0   :  { %s4494_s24 = smov 0   ;;  %s5374_s0 = inlined_call_operand.vmem [shape: f32[2,8,8,32], index: 0, kind: input, shape index: {}]   ;;  %s5375_s1 = inlined_call_operand.vmem [shape: f32[9,40,32], index: 1, kind: input, shape index: {}]   ;;  %s5376_s2 = inlined_call_operand.vmem [shape: f32[1,32], index: 2, kind: input, shape index: {}]   ;;  %s5377_s3 = inlined_call_operand.vmem [shape: f32[1,32], index: 3, kind: input, shape index: {}]   ;;  %s5378_s4 = inlined_call_operand.vmem [shape: f32[9,40,32], index: 4, kind: input, shape index: {}]   ;;  %s5379_s5 = inlined_call_operand.vmem [shape: f32[1,32], index: 5, kind: input, shape index: {}]   ;;  %s5380_s6 = inlined_call_operand.vmem [shape: f32[1,32], index: 6, kind: input, shape index: {}]   ;;  %s5381_s7 = inlined_call_operand.vmem [shape: f32[2,64,32], index: 7, kind: output, shape index: {}]  }
   0x1 LB: > { %s3283_s25 = sadd.s32 4294967295, %s4450_s24   ;;  %p3287_p0 = scmp.ge.s32.totalorder %s4450_s24, 1  ;;  %s4450_s24 = sphi %s4494_s24, %s17_s24  }
   0x2   : > { %p237_p1 = scmp.lt.s32.totalorder %s4450_s24, 3 }
   0x4   : > { %p238_p2 = pnand %p3287_p0, %p237_p1 }
   0x5   : > { %p4504_p3 = scmp.lt.s32.totalorder (!%p238_p2), %s3283_s25, 1  ;;  %v3292_v0 = vld [vmem:[%s5375_s1 + $0x28] sm:$0xff] (!%p238_p2)  ;;  %v3293_v1 = vld [vmem:[%s5375_s1 + $0x30] sm:$0xff] (!%p238_p2)  ;;  %vm304_vm0 = vcmask (!%p238_p2), 31744   ;;  %v4452_v3 = vmov (!%p238_p2), 0.0   ;;  %vm313_vm1 = vcmask (!%p238_p2), 326944  }
   0x6   : > { %241 = sbr.rel (%p238_p2) target bundleno = 973 (0x3cd), region = 48  ;;  %v4514_v2 = vpack.c.bf16 (!%p238_p2), %v3293_v1, %v3292_v0  ;;  %305 = vst.msk [vmem:[#allocation2 + $0x11] sm:$0xff] (!%p238_p2), %vm304_vm0, %v4452_v3  ;;  %306 = vst.msk [vmem:[#allocation2 + $0x21] sm:$0xff] (!%p238_p2), %vm304_vm0, %v4452_v3  ;;  %v3294_v4 = vld [vmem:[%s5375_s1 + $0x38] sm:$0xff] (!%p238_p2)  ;;  %v3295_v5 = vld [vmem:[%s5375_s1 + $0x40] sm:$0xff] (!%p238_p2)  ;;  %vm279_vm2 = vcmask (!%p238_p2), 326656  }
   0x7   : > { %307 = vst.msk [vmem:[#allocation2 + $0x31] sm:$0xff] (!%p238_p2), %vm304_vm0, %v4452_v3  ;;  %308 = vst.msk [vmem:[#allocation2 + $0x41] sm:$0xff] (!%p238_p2), %vm304_vm0, %v4452_v3  ;;  %v4562_v6 = vpack.c.bf16 (!%p238_p2), %v3295_v5, %v3294_v4  ;;  %vm281_vm3 = vcmask (!%p238_p2), 320512   ;;  %vm287_vm4 = vcmask (!%p238_p2), 319488   ;;  %v3296_v7 = vld [vmem:[%s5375_s1 + $0x48] sm:$0xff] (!%p238_p2)  ;;  %v417_v8 = vld [vmem:[%s5375_s1] sm:$0xff] (!%p238_p2) }
   0x8   : > { %309 = vst.msk [vmem:[#allocation2 + $0x51] sm:$0xff] (!%p238_p2), %vm304_vm0, %v4452_v3  ;;  %310 = vst.msk [vmem:[#allocation2 + $0x61] sm:$0xff] (!%p238_p2), %vm304_vm0, %v4452_v3  ;;  %4155 = vmatprep.subr.bf16.mxu0 (!%p238_p2), %v4514_v2  ;;  %v418_v11 = vld [vmem:[%s5375_s1 + $0x8] sm:$0xff] (!%p238_p2)  ;;  %s4453_s22 = smov (!%p238_p2), 4   ;;  %vm400_vm5 = vcmask (!%p238_p2), 293920   ;;  %v419_v24 = vld [vmem:[%s5375_s1 + $0x10] sm:$0xff] (!%p238_p2) }
   0x9   : > { %311 = vst.msk [vmem:[#allocation2 + $0x71] sm:$0xff] (!%p238_p2), %vm304_vm0, %v4452_v3  ;;  %312 = vst.msk [vmem:[#allocation2 + $0x81] sm:$0xff] (!%p238_p2), %vm304_vm0, %v4452_v3  ;;  %4157 = vmatpush3.bf16.msra.mxu0 (!%p238_p2), %v4514_v2  ;;  %v4162_v14 = vpack.c.bf16 (!%p238_p2), %v418_v11, %v417_v8  ;;  %v420_v25 = vld [vmem:[%s5375_s1 + $0x18] sm:$0xff] (!%p238_p2)  ;;  %v421_v35 = vld [vmem:[%s5375_s1 + $0x20] sm:$0xff] (!%p238_p2)  ;;  %vm3219_vm6 = vcmask (!%p238_p2), 261120  }
   0xa   : > { %344 = vst.msk [vmem:[#allocation3 + $0x11] sm:$0xff] (!%p238_p2), %vm304_vm0, %v4452_v3  ;;  %345 = vst.msk [vmem:[#allocation3 + $0x21] sm:$0xff] (!%p238_p2), %vm304_vm0, %v4452_v3  ;;  %4159 = vmatprep.subr.bf16.mxu0 (!%p238_p2), %v4562_v6  ;;  %v4166_v26 = vpack.c.bf16 (!%p238_p2), %v420_v25, %v419_v24  ;;  %v3313_v36 = vld [vmem:[%s5375_s1 + $0x50] sm:$0xff] (!%p238_p2)  ;;  %v3314_v37 = vld [vmem:[%s5375_s1 + $0x58] sm:$0xff] (!%p238_p2) }
   0xb   : > { %346 = vst.msk [vmem:[#allocation3 + $0x31] sm:$0xff] (!%p238_p2), %vm304_vm0, %v4452_v3  ;;  %347 = vst.msk [vmem:[#allocation3 + $0x41] sm:$0xff] (!%p238_p2), %vm304_vm0, %v4452_v3  ;;  %v4170_v40 = vpack.c.bf16 (!%p238_p2), %v3314_v37, %v3313_v36  ;;  %v3315_v43 = vld [vmem:[%s5375_s1 + $0x60] sm:$0xff] (!%p238_p2)  ;;  %v3316_v44 = vld [vmem:[%s5375_s1 + $0x68] sm:$0xff] (!%p238_p2) }
   0xc   : > { %348 = vst.msk [vmem:[#allocation3 + $0x51] sm:$0xff] (!%p238_p2), %vm304_vm0, %v4452_v3  ;;  %349 = vst.msk [vmem:[#allocation3 + $0x61] sm:$0xff] (!%p238_p2), %vm304_vm0, %v4452_v3  ;;  %v4174_v45 = vpack.c.bf16 (!%p238_p2), %v3316_v44, %v3315_v43  ;;  %v3317_v48 = vld [vmem:[%s5375_s1 + $0x70] sm:$0xff] (!%p238_p2)  ;;  %v3326_v50 = vld [vmem:[%s5375_s1 + $0x78] sm:$0xff] (!%p238_p2) }
   0xd   : > { %350 = vst.msk [vmem:[#allocation3 + $0x71] sm:$0xff] %vm304_vm0, %v4452_v3  ;;  %351 = vst.msk [vmem:[#allocation3 + $0x81] sm:$0xff] %vm304_vm0, %v4452_v3  ;;  %s5384_s25 = smov (!%p4504_p3, %s3283_s25), 1  ;;  %4161 = vmatpush3.bf16.msra.mxu0 %v4562_v6  ;;  %v3327_v51 = vld [vmem:[%s5375_s1 + $0x80] sm:$0xff]  ;;  %v3328_v58 = vld [vmem:[%s5375_s1 + $0x88] sm:$0xff] }
   0xe   : > { %314 = vst.msk [vmem:[#allocation2 + $0x11] sm:$0xff] %vm313_vm1, %v4452_v3  ;;  %315 = vst.msk [vmem:[#allocation2 + $0x21] sm:$0xff] %vm313_vm1, %v4452_v3  ;;  %s3522_s12 = sshll.u32 %s5384_s25, 6  ;;  %3766 = vmatprep.subr.mxu0 %v3296_v7  ;;  %v4178_v53 = vpack.c.bf16 %v3327_v51, %v3326_v50  ;;  %v3329_v59 = vld [vmem:[%s5375_s1 + $0x90] sm:$0xff]  ;;  %v3330_v63 = vld [vmem:[%s5375_s1 + $0x98] sm:$0xff] }
   0xf   : > { %316 = vst.msk [vmem:[#allocation2 + $0x31] sm:$0xff] %vm313_vm1, %v4452_v3  ;;  %317 = vst.msk [vmem:[#allocation2 + $0x41] sm:$0xff] %vm313_vm1, %v4452_v3  ;;  %s4678_s15 = scalar_lea.vmem %s5374_s0, %s3522_s12  ;;  %v4182_v60 = vpack.c.bf16 %v3329_v59, %v3328_v58  ;;  %v3339_v1 = vld [vmem:[%s5375_s1 + $0xa0] sm:$0xff]  ;;  %v3340_v2 = vld [vmem:[%s5375_s1 + $0xa8] sm:$0xff]  ;;  %s5346_s11 = scalar_lea.vmem %s5381_s7, %s3522_s12 }
  0x10   : > { %318 = vst.msk [vmem:[#allocation2 + $0x51] sm:$0xff] %vm313_vm1, %v4452_v3  ;;  %319 = vst.msk [vmem:[#allocation2 + $0x61] sm:$0xff] %vm313_vm1, %v4452_v3  ;;  %v360_v9 = vld [vmem:[%s4678_s15] sm:$0xff]  ;;  %v362_v10 = vld [vmem:[%s4678_s15 + $0x10] sm:$0xff]  ;;  %v4186_v4 = vpack.c.bf16 %v3340_v2, %v3339_v1 }
  0x11   : > { %320 = vst.msk [vmem:[#allocation2 + $0x71] sm:$0xff] %vm313_vm1, %v4452_v3  ;;  %321 = vst.msk [vmem:[#allocation2 + $0x81] sm:$0xff] %vm313_vm1, %v4452_v3  ;;  %376 = vrot.lane.b32.xlu0 %v360_v9, %s4453_s22  ;;  %380 = vrot.lane.b32.xlu1 %v362_v10, %s4453_s22  ;;  %v361_v12 = vld [vmem:[%s4678_s15 + $0x8] sm:$0xff]  ;;  %v363_v13 = vld [vmem:[%s4678_s15 + $0x18] sm:$0xff] }
  0x12   : > { %352 = vst.msk [vmem:[#allocation3 + $0x11] sm:$0xff] %vm313_vm1, %v4452_v3  ;;  %353 = vst.msk [vmem:[#allocation3 + $0x21] sm:$0xff] %vm313_vm1, %v4452_v3  ;;  %v364_v16 = vld [vmem:[%s4678_s15 + $0x20] sm:$0xff]  ;;  %v365_v17 = vld [vmem:[%s4678_s15 + $0x28] sm:$0xff]  ;;  %3767 = vmatpush3.msra.mxu0 %v3296_v7 }
  0x13   : > { %354 = vst.msk [vmem:[#allocation3 + $0x31] sm:$0xff] %vm313_vm1, %v4452_v3  ;;  %355 = vst.msk [vmem:[#allocation3 + $0x41] sm:$0xff] %vm313_vm1, %v4452_v3  ;;  %4163 = vmatprep.subr.bf16.mxu0 %v4162_v14  ;;  %v366_v18 = vld [vmem:[%s4678_s15 + $0x30] sm:$0xff]  ;;  %v367_v19 = vld [vmem:[%s4678_s15 + $0x38] sm:$0xff] }
  0x14   : > { %356 = vst.msk [vmem:[#allocation3 + $0x51] sm:$0xff] %vm313_vm1, %v4452_v3  ;;  %357 = vst.msk [vmem:[#allocation3 + $0x61] sm:$0xff] %vm313_vm1, %v4452_v3  ;;  %v3341_v8 = vld [vmem:[%s5375_s1 + $0xb0] sm:$0xff]  ;;  %v3342_v9 = vld [vmem:[%s5375_s1 + $0xb8] sm:$0xff] }
  0x15   : > { %358 = vst.msk [vmem:[#allocation3 + $0x71] sm:$0xff] %vm313_vm1, %v4452_v3  ;;  %359 = vst.msk [vmem:[#allocation3 + $0x81] sm:$0xff] %vm313_vm1, %v4452_v3  ;;  %378 = vrot.lane.b32.xlu0 %v361_v12, %s4453_s22  ;;  %382 = vrot.lane.b32.xlu1 %v363_v13, %s4453_s22  ;;  %v4190_v10 = vpack.c.bf16 %v3342_v9, %v3341_v8  ;;  %v3343_v11 = vld [vmem:[%s5375_s1 + $0xc0] sm:$0xff]  ;;  %v3352_v12 = vld [vmem:[%s5375_s1 + $0xc8] sm:$0xff] }
  0x16   : > { %280 = vst.msk [vmem:[#allocation2] sm:$0xff] %vm279_vm2, %v4452_v3  ;;  %284 = vst.msk [vmem:[#allocation2 + $0x90] sm:$0xff] %vm279_vm2, %v4452_v3  ;;  %v3353_v13 = vld [vmem:[%s5375_s1 + $0xd0] sm:$0xff]  ;;  %v3367_v24 = vld [vmem:[%s5375_s1 + $0x100] sm:$0xff] }
  0x17   : > { %322 = vst.msk [vmem:[#allocation3] sm:$0xff] %vm279_vm2, %v4452_v3  ;;  %325 = vst.msk [vmem:[#allocation3 + $0x90] sm:$0xff] %vm279_vm2, %v4452_v3  ;;  %v3368_v25 = vld [vmem:[%s5375_s1 + $0x108] sm:$0xff]  ;;  %v3381_v36 = vld [vmem:[%s5375_s1 + $0x130] sm:$0xff] }
  0x18   : > { %282 = vst.msk [vmem:[#allocation2 + $0x8] sm:$0x3] %vm281_vm3, %v4452_v3  ;;  %285 = vst.msk [vmem:[#allocation2 + $0x98] sm:$0x3] %vm281_vm3, %v4452_v3  ;;  %v3392_v43 = vld [vmem:[%s5375_s1 + $0x148] sm:$0xff]  ;;  %v3409_v50 = vld [vmem:[%s5378_s4 + $0x40] sm:$0xff] }
  0x19   : > { %323 = vst.msk [vmem:[#allocation3 + $0x8] sm:$0x3] %vm281_vm3, %v4452_v3  ;;  %326 = vst.msk [vmem:[#allocation3 + $0x98] sm:$0x3] %vm281_vm3, %v4452_v3  ;;  %384 = vrot.lane.b32.xlu0 %v364_v16, %s4453_s22  ;;  %386 = vrot.lane.b32.xlu1 %v365_v17, %s4453_s22  ;;  %v3354_v16 = vld [vmem:[%s5375_s1 + $0xd8] sm:$0xff]  ;;  %v3355_v17 = vld [vmem:[%s5375_s1 + $0xe0] sm:$0xff] }
  0x1a   : > { %288 = vst.msk [vmem:[#allocation2 + $0x10] sm:$0x1] %vm287_vm4, %v4452_v3  ;;  %289 = vst.msk [vmem:[#allocation2 + $0x20] sm:$0x1] %vm287_vm4, %v4452_v3 }
  0x1b   : > { %290 = vst.msk [vmem:[#allocation2 + $0x30] sm:$0x1] %vm287_vm4, %v4452_v3  ;;  %291 = vst.msk [vmem:[#allocation2 + $0x40] sm:$0x1] %vm287_vm4, %v4452_v3 }
  0x1c   : > { %292 = vst.msk [vmem:[#allocation2 + $0x50] sm:$0x1] %vm287_vm4, %v4452_v3  ;;  %293 = vst.msk [vmem:[#allocation2 + $0x60] sm:$0x1] %vm287_vm4, %v4452_v3 }
  0x1d   : > { %294 = vst.msk [vmem:[#allocation2 + $0x70] sm:$0x1] %vm287_vm4, %v4452_v3  ;;  %295 = vst.msk [vmem:[#allocation2 + $0x80] sm:$0x1] %vm287_vm4, %v4452_v3  ;;  %388 = vrot.lane.b32.xlu0 %v366_v18, %s4453_s22  ;;  %390 = vrot.lane.b32.xlu1 %v367_v19, %s4453_s22  ;;  %v409_v42 = vld [vmem:[#allocation2] sm:$0xff]  ;;  %v4198_v18 = vpack.c.bf16 %v3355_v17, %v3354_v16  ;;  %v3356_v19 = vld [vmem:[%s5375_s1 + $0xe8] sm:$0xff] }
  0x1e   : > { %296 = vst.msk [vmem:[#allocation2 + $0x19] sm:$0x1] %vm287_vm4, %v4452_v3  ;;  %297 = vst.msk [vmem:[#allocation2 + $0x29] sm:$0x1] %vm287_vm4, %v4452_v3 }
  0x1f   : > { %298 = vst.msk [vmem:[#allocation2 + $0x39] sm:$0x1] %vm287_vm4, %v4452_v3  ;;  %299 = vst.msk [vmem:[#allocation2 + $0x49] sm:$0x1] %vm287_vm4, %v4452_v3  ;;  %v422_v15 = vld [vmem:[#allocation2 + $0x1] sm:$0xff] }
  0x20   : > { %300 = vst.msk [vmem:[#allocation2 + $0x59] sm:$0x1] %vm287_vm4, %v4452_v3  ;;  %301 = vst.msk [vmem:[#allocation2 + $0x69] sm:$0x1] %vm287_vm4, %v4452_v3  ;;  %3768 = vmatprep.mubr.msk.f32.mxu0 %vm279_vm2, %v422_v15  ;;  %v694_v56 = vld [vmem:[#allocation2 + $0x2] sm:$0xff] }
  0x21   : > { %302 = vst.msk [vmem:[#allocation2 + $0x79] sm:$0x1] %vm287_vm4, %v4452_v3  ;;  %303 = vst.msk [vmem:[#allocation2 + $0x89] sm:$0x1] %vm287_vm4, %v4452_v3  ;;  %v1843_v59 = vld [vmem:[#allocation3 + $0x1] sm:$0xff] }
  0x22   : > { %328 = vst.msk [vmem:[#allocation3 + $0x10] sm:$0x1] %vm287_vm4, %v4452_v3  ;;  %329 = vst.msk [vmem:[#allocation3 + $0x20] sm:$0x1] %vm287_vm4, %v4452_v3  ;;  %3966 = vmatprep.mubr.msk.f32.mxu1 %vm279_vm2, %v1843_v59 }
  0x23   : > { %330 = vst.msk [vmem:[#allocation3 + $0x30] sm:$0x1] %vm287_vm4, %v4452_v3  ;;  %331 = vst.msk [vmem:[#allocation3 + $0x40] sm:$0x1] %vm287_vm4, %v4452_v3 }
  0x24   : > { %332 = vst.msk [vmem:[#allocation3 + $0x50] sm:$0x1] %vm287_vm4, %v4452_v3  ;;  %333 = vst.msk [vmem:[#allocation3 + $0x60] sm:$0x1] %vm287_vm4, %v4452_v3 }
  0x25   : > { %334 = vst.msk [vmem:[#allocation3 + $0x70] sm:$0x1] %vm287_vm4, %v4452_v3  ;;  %335 = vst.msk [vmem:[#allocation3 + $0x80] sm:$0x1] %vm287_vm4, %v4452_v3 }
  0x26   : > { %336 = vst.msk [vmem:[#allocation3 + $0x19] sm:$0x1] %vm287_vm4, %v4452_v3  ;;  %337 = vst.msk [vmem:[#allocation3 + $0x29] sm:$0x1] %vm287_vm4, %v4452_v3 }
  0x27   : > { %338 = vst.msk [vmem:[#allocation3 + $0x39] sm:$0x1] %vm287_vm4, %v4452_v3  ;;  %339 = vst.msk [vmem:[#allocation3 + $0x49] sm:$0x1] %vm287_vm4, %v4452_v3 }
  0x28   : > { %340 = vst.msk [vmem:[#allocation3 + $0x59] sm:$0x1] %vm287_vm4, %v4452_v3  ;;  %341 = vst.msk [vmem:[#allocation3 + $0x69] sm:$0x1] %vm287_vm4, %v4452_v3 }
  0x29   : > { %342 = vst.msk [vmem:[#allocation3 + $0x79] sm:$0x1] %vm287_vm4, %v4452_v3  ;;  %343 = vst.msk [vmem:[#allocation3 + $0x89] sm:$0x1] %vm287_vm4, %v4452_v3 }
  0x83   : > { %v377_v20 = vpop.permute.xlu0 %376  ;;  %v381_v21 = vpop.permute.xlu1 %380 }
  0x84   : > { %401 = vst.msk [vmem:[#allocation2 + $0x11] sm:$0xff] %vm400_vm5, %v377_v20  ;;  %403 = vst.msk [vmem:[#allocation2 + $0x31] sm:$0xff] %vm400_vm5, %v381_v21  ;;  %v3365_v20 = vld [vmem:[%s5375_s1 + $0xf0] sm:$0xff]  ;;  %v3366_v21 = vld [vmem:[%s5375_s1 + $0xf8] sm:$0xff] }
  0x87   : > { %v379_v22 = vpop.permute.xlu0 %378  ;;  %v383_v23 = vpop.permute.xlu1 %382 }
  0x88   : > { %402 = vst.msk [vmem:[#allocation2 + $0x21] sm:$0xff] %vm400_vm5, %v379_v22  ;;  %404 = vst.msk [vmem:[#allocation2 + $0x41] sm:$0xff] %vm400_vm5, %v383_v23  ;;  %v4202_v22 = vpack.c.bf16 %v3366_v21, %v3365_v20 }
  0x8b   : > { %v4718_v27 = vld [vmem:[#allocation2 + $0x11] sm:$0xff]  ;;  %v385_v28 = vpop.permute.xlu0 %384  ;;  %v387_v29 = vpop.permute.xlu1 %386 }
  0x8c   : > { %3769 = vmatmul.mubr.msk.f32.vlgmr.msra.gmra.mrb[0].mxu0 %vm279_vm2, %v4718_v27  ;;  %405 = vst.msk [vmem:[#allocation2 + $0x51] sm:$0xff] %vm400_vm5, %v385_v28  ;;  %406 = vst.msk [vmem:[#allocation2 + $0x61] sm:$0xff] %vm400_vm5, %v387_v29  ;;  %v4724_v30 = vld [vmem:[#allocation2 + $0x31] sm:$0xff]  ;;  %v3379_v29 = vld [vmem:[%s5375_s1 + $0x120] sm:$0xff] }
  0x8d   : > { %4165 = vmatpush3.bf16.msra.mxu0 %v4162_v14  ;;  %v410_v46 = vld [vmem:[#allocation2 + $0x10] sm:$0xff]  ;;  %v4194_v14 = vpack.c.bf16 %v3353_v13, %v3352_v12  ;;  %v3378_v28 = vld [vmem:[%s5375_s1 + $0x118] sm:$0xff] }
  0x8e   : > { %4167 = vmatprep.subr.bf16.mxu0 %v4166_v26  ;;  %v4774_v49 = vld [vmem:[#allocation2 + $0x30] sm:$0xff] }
  0x8f   : > { %v4726_v31 = vld [vmem:[#allocation2 + $0x21] sm:$0xff]  ;;  %v389_v32 = vpop.permute.xlu0 %388  ;;  %v391_v34 = vpop.permute.xlu1 %390  ;;  %v4807_v61 = vld [vmem:[#allocation2 + $0x12] sm:$0xff] }
  0x90   : > { %v4728_v33 = vld [vmem:[#allocation2 + $0x41] sm:$0xff]  ;;  %3771 = vmatprep.mubr.msk.f32.mxu0 %vm279_vm2, %v4726_v31  ;;  %407 = vst.msk [vmem:[#allocation2 + $0x71] sm:$0xff] %vm400_vm5, %v389_v32  ;;  %408 = vst.msk [vmem:[#allocation2 + $0x81] sm:$0xff] %vm400_vm5, %v391_v34  ;;  %v4818_v0 = vld [vmem:[#allocation2 + $0x32] sm:$0xff]  ;;  %v4210_v32 = vpack.c.bf16 %v3379_v29, %v3378_v28 }
  0x91   : > { %3772 = vmatmul.mubr.msk.f32.gmra.mrb[2].mxu0 %vm279_vm2, %v4724_v30  ;;  %v4767_v47 = vld [vmem:[#allocation2 + $0x20] sm:$0xff] }
  0x92   : > { %4169 = vmatpush3.bf16.msra.mxu0 %v4166_v26  ;;  %3774 = vmatprep.mubr.msk.f32.mxu0 %vm279_vm2, %v4728_v33  ;;  %v4784_v52 = vld [vmem:[#allocation2 + $0x40] sm:$0xff]  ;;  %v4206_v26 = vpack.c.bf16 %v3368_v25, %v3367_v24 }
  0x93   : > { %v4747_v38 = vld [vmem:[#allocation2 + $0x51] sm:$0xff]  ;;  %3788 = vmatprep.subr.mxu0 %v421_v35  ;;  %v4749_v39 = vld [vmem:[#allocation2 + $0x61] sm:$0xff] }
  0x94   : > { %v4788_v54 = vld [vmem:[#allocation2 + $0x50] sm:$0xff]  ;;  %v4792_v55 = vld [vmem:[#allocation2 + $0x60] sm:$0xff] }
  0x95   : > { %3775 = vmatmul.mubr.msk.f32.gmra.mrb[4].mxu0 %vm279_vm2, %v4747_v38  ;;  %v4811_v62 = vld [vmem:[#allocation2 + $0x22] sm:$0xff]  ;;  %v4832_v5 = vld [vmem:[#allocation2 + $0x52] sm:$0xff] }
  0x96   : > { %3777 = vmatprep.mubr.msk.f32.mxu0 %vm279_vm2, %v4749_v39  ;;  %3789 = vmatpush3.msra.mxu0 %v421_v35  ;;  %v4828_v3 = vld [vmem:[#allocation2 + $0x42] sm:$0xff] }
  0x97   : > { %v4755_v41 = vld [vmem:[#allocation2 + $0x71] sm:$0xff]  ;;  %4171 = vmatprep.subr.bf16.mxu0 %v4170_v40  ;;  %v4836_v6 = vld [vmem:[#allocation2 + $0x62] sm:$0xff] }
  0x98   : > { %v4796_v57 = vld [vmem:[#allocation2 + $0x70] sm:$0xff]  ;;  %v4872_v15 = vld [vmem:[#allocation2 + $0x80] sm:$0xff]  ;;  %v3380_v35 = vld [vmem:[%s5375_s1 + $0x128] sm:$0xff] }
  0x99   : > { %3778 = vmatmul.mubr.msk.f32.gmra.mrb[6].mxu0 %vm279_vm2, %v4755_v41  ;;  %v4840_v7 = vld [vmem:[#allocation2 + $0x72] sm:$0xff]  ;;  %v1003_v23 = vld [vmem:[#allocation2 + $0x81] sm:$0xff]  ;;  %v4214_v37 = vpack.c.bf16 %v3381_v36, %v3380_v35 }
  0x9a   : > { %3790 = vmatprep.mubr.msk.f32.mxu0 %vm279_vm2, %v409_v42  ;;  %v1154_v34 = vld [vmem:[#allocation2 + $0x82] sm:$0xff]  ;;  %v1841_v35 = vld [vmem:[%s5378_s4 + $0x18] sm:$0xff] }
  0x9b   : > { %v3391_v42 = vld [vmem:[%s5375_s1 + $0x140] sm:$0xff] }
  0x9c   : > { %v4218_v44 = vpack.c.bf16 %v3392_v43, %v3391_v42 }
  0x9d   : > { %3791 = vmatmul.mubr.msk.f32.vlgmr.msra.gmra.mrb[0].mxu0 %vm279_vm2, %v410_v46 }
  0x9e   : > { %4173 = vmatpush3.bf16.msra.mxu0 %v4170_v40  ;;  %3793 = vmatprep.mubr.msk.f32.mxu0 %vm279_vm2, %v4767_v47  ;;  %v3382_v40 = vld [vmem:[%s5375_s1 + $0x138] sm:$0xff] }
  0x9f   : > { %4175 = vmatprep.subr.bf16.mxu0 %v4174_v45 }
  0xa1   : > { %3794 = vmatmul.mubr.msk.f32.gmra.mrb[2].mxu0 %vm279_vm2, %v4774_v49 }
  0xa2   : > { %3796 = vmatprep.mubr.msk.f32.mxu0 %vm279_vm2, %v4784_v52  ;;  %4177 = vmatpush3.bf16.msra.mxu0 %v4174_v45  ;;  %v1306_v45 = vld [vmem:[#allocation2 + $0x90] sm:$0xff] }
  0xa3   : > { %3810 = vmatprep.subr.mxu0 %v3317_v48 }
  0xa5   : > { %3797 = vmatmul.mubr.msk.f32.gmra.mrb[4].mxu0 %vm279_vm2, %v4788_v54 }
  0xa6   : > { %3799 = vmatprep.mubr.msk.f32.mxu0 %vm279_vm2, %v4792_v55  ;;  %3811 = vmatpush3.msra.mxu0 %v3317_v48 }
  0xa7   : > { %4179 = vmatprep.subr.bf16.mxu0 %v4178_v53 }
  0xa9   : > { %3800 = vmatmul.mubr.msk.f32.gmra.mrb[6].mxu0 %vm279_vm2, %v4796_v57 }
  0xaa   : > { %3812 = vmatprep.mubr.msk.f32.mxu0 %vm279_vm2, %v694_v56 }
  0xad   : > { %3813 = vmatmul.mubr.msk.f32.vlgmr.msra.gmra.mrb[0].mxu0 %vm279_vm2, %v4807_v61 }
  0xae   : > { %4181 = vmatpush3.bf16.msra.mxu0 %v4178_v53  ;;  %3815 = vmatprep.mubr.msk.f32.mxu0 %vm279_vm2, %v4811_v62  ;;  %v3410_v53 = vld [vmem:[%s5378_s4 + $0x48] sm:$0xff] }
  0xaf   : > { %4183 = vmatprep.subr.bf16.mxu0 %v4182_v60 }
  0xb1   : > { %3816 = vmatmul.mubr.msk.f32.gmra.mrb[2].mxu0 %vm279_vm2, %v4818_v0 }
  0xb2   : > { %3818 = vmatprep.mubr.msk.f32.mxu0 %vm279_vm2, %v4828_v3  ;;  %4185 = vmatpush3.bf16.msra.mxu0 %v4182_v60  ;;  %v1838_v60 = vld [vmem:[%s5378_s4] sm:$0xff] }
  0xb3   : > { %3832 = vmatprep.subr.mxu0 %v3330_v63 }
  0xb5   : > { %3819 = vmatmul.mubr.msk.f32.gmra.mrb[4].mxu0 %vm279_vm2, %v4832_v5 }
  0xb6   : > { %3821 = vmatprep.mubr.msk.f32.mxu0 %vm279_vm2, %v4836_v6  ;;  %3833 = vmatpush3.msra.mxu0 %v3330_v63 }
  0xb7   : > { %4187 = vmatprep.subr.bf16.mxu0 %v4186_v4 }
  0xb9   : > { %3822 = vmatmul.mubr.msk.f32.gmra.mrb[6].mxu0 %vm279_vm2, %v4840_v7 }
  0xba   : > { %3834 = vmatprep.mubr.msk.f32.mxu0 %vm279_vm2, %v410_v46  ;;  %v3393_v46 = vld [vmem:[%s5375_s1 + $0x150] sm:$0xff] }
  0xbd   : > { %3835 = vmatmul.mubr.msk.f32.vlgmr.msra.gmra.mrb[0].mxu0 %vm279_vm2, %v4767_v47 }
  0xbe   : > { %4189 = vmatpush3.bf16.msra.mxu0 %v4186_v4  ;;  %3837 = vmatprep.mubr.msk.f32.mxu0 %vm279_vm2, %v4774_v49 }
  0xbf   : > { %4191 = vmatprep.subr.bf16.mxu0 %v4190_v10 }
  0xc1   : > { %3838 = vmatmul.mubr.msk.f32.gmra.mrb[2].mxu0 %vm279_vm2, %v4784_v52 }
  0xc2   : > { %3840 = vmatprep.mubr.msk.f32.mxu0 %vm279_vm2, %v4788_v54  ;;  %4193 = vmatpush3.bf16.msra.mxu0 %v4190_v10 }
  0xc3   : > { %3854 = vmatprep.subr.mxu0 %v3343_v11 }
  0xc5   : > { %3841 = vmatmul.mubr.msk.f32.gmra.mrb[4].mxu0 %vm279_vm2, %v4792_v55 }
  0xc6   : > { %3843 = vmatprep.mubr.msk.f32.mxu0 %vm279_vm2, %v4796_v57  ;;  %3855 = vmatpush3.msra.mxu0 %v3343_v11 }
  0xc7   : > { %4195 = vmatprep.subr.bf16.mxu0 %v4194_v14 }
  0xc9   : > { %3844 = vmatmul.mubr.msk.f32.gmra.mrb[6].mxu0 %vm279_vm2, %v4872_v15 }
  0xca   : > { %3856 = vmatprep.mubr.msk.f32.mxu0 %vm279_vm2, %v4718_v27  ;;  %v3369_v27 = vld [vmem:[%s5375_s1 + $0x110] sm:$0xff] }
  0xcd   : > { %3857 = vmatmul.mubr.msk.f32.vlgmr.msra.gmra.mrb[0].mxu0 %vm279_vm2, %v4726_v31 }
  0xce   : > { %4197 = vmatpush3.bf16.msra.mxu0 %v4194_v14  ;;  %3859 = vmatprep.mubr.msk.f32.mxu0 %vm279_vm2, %v4724_v30 }
  0xcf   : > { %4199 = vmatprep.subr.bf16.mxu0 %v4198_v18 }
  0xd1   : > { %3860 = vmatmul.mubr.msk.f32.gmra.mrb[2].mxu0 %vm279_vm2, %v4728_v33 }
  0xd2   : > { %3862 = vmatprep.mubr.msk.f32.mxu0 %vm279_vm2, %v4747_v38  ;;  %4201 = vmatpush3.bf16.msra.mxu0 %v4198_v18 }
  0xd3   : > { %3876 = vmatprep.subr.mxu0 %v3356_v19 }
  0xd5   : > { %3863 = vmatmul.mubr.msk.f32.gmra.mrb[4].mxu0 %vm279_vm2, %v4749_v39 }
  0xd6   : > { %3865 = vmatprep.mubr.msk.f32.mxu0 %vm279_vm2, %v4755_v41  ;;  %3877 = vmatpush3.msra.mxu0 %v3356_v19 }
  0xd7   : > { %4203 = vmatprep.subr.bf16.mxu0 %v4202_v22 }
  0xd9   : > { %3866 = vmatmul.mubr.msk.f32.gmra.mrb[6].mxu0 %vm279_vm2, %v1003_v23 }
  0xda   : > { %3878 = vmatprep.mubr.msk.f32.mxu0 %vm279_vm2, %v4807_v61  ;;  %v1839_v61 = vld [vmem:[%s5378_s4 + $0x8] sm:$0xff] }
  0xdb   : > { %v4234_v63 = vpack.c.bf16 %v1839_v61, %v1838_v60 }
  0xdd   : > { %3879 = vmatmul.mubr.msk.f32.vlgmr.msra.gmra.mrb[0].mxu0 %vm279_vm2, %v4811_v62 }
  0xde   : > { %4205 = vmatpush3.bf16.msra.mxu0 %v4202_v22  ;;  %3881 = vmatprep.mubr.msk.f32.mxu0 %vm279_vm2, %v4818_v0 }
  0xdf   : > { %4207 = vmatprep.subr.bf16.mxu0 %v4206_v26 }
  0xe1   : > { %3882 = vmatmul.mubr.msk.f32.gmra.mrb[2].mxu0 %vm279_vm2, %v4828_v3 }
  0xe2   : > { %3884 = vmatprep.mubr.msk.f32.mxu0 %vm279_vm2, %v4832_v5  ;;  %4209 = vmatpush3.bf16.msra.mxu0 %v4206_v26 }
  0xe3   : > { %3898 = vmatprep.subr.mxu0 %v3369_v27 }
  0xe5   : > { %3885 = vmatmul.mubr.msk.f32.gmra.mrb[4].mxu0 %vm279_vm2, %v4836_v6 }
  0xe6   : > { %3887 = vmatprep.mubr.msk.f32.mxu0 %vm279_vm2, %v4840_v7  ;;  %3899 = vmatpush3.msra.mxu0 %v3369_v27 }
  0xe7   : > { %4211 = vmatprep.subr.bf16.mxu0 %v4210_v32 }
  0xe9   : > { %3888 = vmatmul.mubr.msk.f32.gmra.mrb[6].mxu0 %vm279_vm2, %v1154_v34 }
  0xea   : > { %3900 = vmatprep.mubr.msk.f32.mxu0 %vm279_vm2, %v4767_v47  ;;  %v3394_v47 = vld [vmem:[%s5375_s1 + $0x158] sm:$0xff] }
  0xeb   : > { %v4222_v48 = vpack.c.bf16 %v3394_v47, %v3393_v46 }
  0xed   : > { %3901 = vmatmul.mubr.msk.f32.vlgmr.msra.gmra.mrb[0].mxu0 %vm279_vm2, %v4774_v49  ;;  %v3395_v49 = vld [vmem:[%s5375_s1 + $0x160] sm:$0xff] }
  0xee   : > { %4213 = vmatpush3.bf16.msra.mxu0 %v4210_v32  ;;  %3903 = vmatprep.mubr.msk.f32.mxu0 %vm279_vm2, %v4784_v52  ;;  %v3404_v52 = vld [vmem:[%s5376_s2] ss:$0 sm:$0xff] }
  0xef   : > { %4215 = vmatprep.subr.bf16.mxu0 %v4214_v37 }
  0xf1   : > { %3904 = vmatmul.mubr.msk.f32.gmra.mrb[2].mxu0 %vm279_vm2, %v4788_v54 }
  0xf2   : > { %3906 = vmatprep.mubr.msk.f32.mxu0 %vm279_vm2, %v4792_v55  ;;  %4217 = vmatpush3.bf16.msra.mxu0 %v4214_v37  ;;  %v3405_v55 = vld [vmem:[%s5377_s3] ss:$0 sm:$0xff] }
  0xf3   : > { %3920 = vmatprep.subr.mxu0 %v3382_v40 }
  0xf5   : > { %3907 = vmatmul.mubr.msk.f32.gmra.mrb[4].mxu0 %vm279_vm2, %v4796_v57 }
  0xf6   : > { %3909 = vmatprep.mubr.msk.f32.mxu0 %vm279_vm2, %v4872_v15  ;;  %3921 = vmatpush3.msra.mxu0 %v3382_v40 }
  0xf7   : > { %4219 = vmatprep.subr.bf16.mxu0 %v4218_v44 }
  0xf9   : > { %3910 = vmatmul.mubr.msk.f32.gmra.mrb[6].mxu0 %vm279_vm2, %v1306_v45  ;;  %v1842_v45 = vld [vmem:[%s5378_s4 + $0x20] sm:$0xff] }
  0xfa   : > { %3922 = vmatprep.mubr.msk.f32.mxu0 %vm279_vm2, %v4726_v31  ;;  %v1608_v31 = vld [vmem:[#allocation2 + $0x92] sm:$0xff] }
  0xfd   : > { %3923 = vmatmul.mubr.msk.f32.vlgmr.msra.gmra.mrb[0].mxu0 %vm279_vm2, %v4724_v30  ;;  %v1457_v30 = vld [vmem:[#allocation2 + $0x91] sm:$0xff] }
  0xfe   : > { %4221 = vmatpush3.bf16.msra.mxu0 %v4218_v44  ;;  %3925 = vmatprep.mubr.msk.f32.mxu0 %vm279_vm2, %v4728_v33  ;;  %v3406_v33 = vld [vmem:[%s5378_s4 + $0x28] sm:$0xff] }
  0xff   : > { %4223 = vmatprep.subr.bf16.mxu0 %v4222_v48 }
 0x101   : > { %3926 = vmatmul.mubr.msk.f32.gmra.mrb[2].mxu0 %vm279_vm2, %v4747_v38  ;;  %v3407_v38 = vld [vmem:[%s5378_s4 + $0x30] sm:$0xff] }
 0x102   : > { %3928 = vmatprep.mubr.msk.f32.mxu0 %vm279_vm2, %v4749_v39  ;;  %4225 = vmatpush3.bf16.msra.mxu0 %v4222_v48  ;;  %v4226_v39 = vpack.c.bf16 %v3407_v38, %v3406_v33  ;;  %v3427_v48 = vld [vmem:[%s5378_s4 + $0x50] sm:$0xff] }
 0x103   : > { %3942 = vmatprep.subr.mxu0 %v3395_v49 }
 0x104   : > { %4227 = vmatprep.subr.bf16.mxu1 %v4226_v39 }
 0x105   : > { %3929 = vmatmul.mubr.msk.f32.gmra.mrb[4].mxu0 %vm279_vm2, %v4755_v41  ;;  %4229 = vmatpush3.bf16.msra.mxu1 %v4226_v39  ;;  %v3408_v41 = vld [vmem:[%s5378_s4 + $0x38] sm:$0xff]  ;;  %v1830_v39 = vld [vmem:[#allocation3] sm:$0xff] }
 0x106   : > { %3931 = vmatprep.mubr.msk.f32.mxu0 %vm279_vm2, %v1003_v23  ;;  %3943 = vmatpush3.msra.mxu0 %v3395_v49  ;;  %v4230_v51 = vpack.c.bf16 %v3409_v50, %v3408_v41  ;;  %v3428_v49 = vld [vmem:[%s5378_s4 + $0x58] sm:$0xff]  ;;  %v3429_v50 = vld [vmem:[%s5378_s4 + $0x60] sm:$0xff] }
 0x108   : > { %4231 = vmatprep.subr.bf16.mxu1 %v4230_v51 }
 0x109   : > { %3932 = vmatmul.mubr.msk.f32.gmra.mrb[6].mxu0 %vm279_vm2, %v1457_v30  ;;  %4233 = vmatpush3.bf16.msra.mxu1 %v4230_v51  ;;  %v3430_v51 = vld [vmem:[%s5378_s4 + $0x68] sm:$0xff] }
 0x10a   : > { %3944 = vmatprep.mubr.msk.f32.mxu0 %vm279_vm2, %v4811_v62  ;;  %3964 = vmatprep.subr.mxu1 %v3410_v53 }
 0x10d   : > { %3945 = vmatmul.mubr.msk.f32.vlgmr.msra.gmra.mrb[0].mxu0 %vm279_vm2, %v4818_v0  ;;  %3965 = vmatpush3.msra.mxu1 %v3410_v53 }
 0x10e   : > { %3947 = vmatprep.mubr.msk.f32.mxu0 %vm279_vm2, %v4828_v3  ;;  %4235 = vmatprep.subr.bf16.mxu1 %v4234_v63 }
 0x111   : > { %3948 = vmatmul.mubr.msk.f32.gmra.mrb[2].mxu0 %vm279_vm2, %v4832_v5 }
 0x112   : > { %3950 = vmatprep.mubr.msk.f32.mxu0 %vm279_vm2, %v4836_v6 }
 0x115   : > { %3951 = vmatmul.mubr.msk.f32.gmra.mrb[4].mxu0 %vm279_vm2, %v4840_v7 }
 0x116   : > { %3953 = vmatprep.mubr.msk.f32.mxu0 %vm279_vm2, %v1154_v34  ;;  %v1840_v34 = vld [vmem:[%s5378_s4 + $0x10] sm:$0xff] }
 0x117   : > { %v4238_v37 = vpack.c.bf16 %v1841_v35, %v1840_v34  ;;  %v3481_v34 = vld [vmem:[%s5378_s4 + $0x100] sm:$0xff]  ;;  %v3482_v35 = vld [vmem:[%s5378_s4 + $0x108] sm:$0xff] }
 0x119   : > { %3954 = vmatmul.mubr.msk.f32.gmra.mrb[6].mxu0 %vm279_vm2, %v1608_v31  ;;  %v4242_v31 = vpack.c.bf16 %v3428_v49, %v3427_v48  ;;  %v3495_v48 = vld [vmem:[%s5378_s4 + $0x130] sm:$0xff] }
 0x1e0   : > { %v3946_v54 = vpop.f32.mrb[0].mxu0 }
 0x1e1   : > { %v1760_v56 = vmul.f32 %v3946_v54, %v3404_v52  ;;  %v1705_v57 = vpop.f32.mrb[1].mxu0 }
 0x1e2   : > { %v1759_v58 = vmul.f32 %v3404_v52, %v1705_v57  ;;  %v3440_v57 = vld [vmem:[%s5378_s4 + $0x78] sm:$0xff] }
 0x1e3   : > { %v1775_v62 = vadd.f32 %v3405_v55, %v1760_v56 }
 0x1e4   : > { %v1774_v0 = vadd.f32 %v3405_v55, %v1759_v58  ;;  %v3949_v1 = vpop.f32.mrb[2].mxu0  ;;  %v3441_v58 = vld [vmem:[%s5378_s4 + $0x80] sm:$0xff] }
 0x1e5   : > { %v1783_v2 = vmax.f32 %v1775_v62, 0.0  ;;  %v1762_v3 = vmul.f32 %v3949_v1, %v3404_v52  ;;  %v1715_v4 = vpop.f32.mrb[3].mxu0  ;;  %v4250_v60 = vpack.c.bf16 %v3441_v58, %v3440_v57  ;;  %v3442_v1 = vld [vmem:[%s5378_s4 + $0x88] sm:$0xff] }
 0x1e6   : > { %v1782_v5 = vmax.f32 %v1774_v0, 0.0  ;;  %v1761_v6 = vmul.f32 %v3404_v52, %v1715_v4 }
 0x1e7   : > { %v1777_v7 = vadd.f32 %v3405_v55, %v1762_v3  ;;  %1800 = vrot.lane.b32.xlu1 %v1783_v2, %s4453_s22  ;;  %v3443_v2 = vld [vmem:[%s5378_s4 + $0x90] sm:$0xff] }
 0x1e8   : > { %v1776_v8 = vadd.f32 %v3405_v55, %v1761_v6  ;;  %1798 = vrot.lane.b32.xlu0 %v1782_v5, %s4453_s22  ;;  %v3952_v9 = vpop.f32.mrb[4].mxu0  ;;  %v4254_v3 = vpack.c.bf16 %v3443_v2, %v3442_v1  ;;  %v3444_v6 = vld [vmem:[%s5378_s4 + $0x98] sm:$0xff]  ;;  %v4437_v2 = vld [vmem:[%s4678_s15] sm:$0xff] }
 0x1e9   : > { %v1785_v10 = vmax.f32 %v1777_v7, 0.0  ;;  %v1764_v11 = vmul.f32 %v3952_v9, %v3404_v52  ;;  %v1725_v12 = vpop.f32.mrb[5].mxu0  ;;  %v3454_v9 = vld [vmem:[%s5378_s4 + $0xa8] sm:$0xff] }
 0x1ea   : > { %v1784_v13 = vmax.f32 %v1776_v8, 0.0  ;;  %v1763_v14 = vmul.f32 %v3404_v52, %v1725_v12  ;;  %v3453_v8 = vld [vmem:[%s5378_s4 + $0xa0] sm:$0xff] }
 0x1eb   : > { %v1779_v15 = vadd.f32 %v3405_v55, %v1764_v11  ;;  %1804 = vrot.lane.b32.xlu1 %v1785_v10, %s4453_s22  ;;  %v4258_v11 = vpack.c.bf16 %v3454_v9, %v3453_v8 }
 0x1ec   : > { %v1778_v16 = vadd.f32 %v3405_v55, %v1763_v14  ;;  %1802 = vrot.lane.b32.xlu0 %v1784_v13, %s4453_s22  ;;  %v3955_v17 = vpop.f32.mrb[6].mxu0 }
 0x1ed   : > { %v1787_v18 = vmax.f32 %v1779_v15, 0.0  ;;  %v1766_v19 = vmul.f32 %v3955_v17, %v3404_v52  ;;  %v1735_v20 = vpop.f32.mrb[7].mxu0  ;;  %v3455_v15 = vld [vmem:[%s5378_s4 + $0xb0] sm:$0xff] }
 0x1ee   : > { %v1786_v21 = vmax.f32 %v1778_v16, 0.0  ;;  %v1765_v22 = vmul.f32 %v3404_v52, %v1735_v20  ;;  %v4246_v52 = vpack.c.bf16 %v3430_v51, %v3429_v50  ;;  %v3456_v16 = vld [vmem:[%s5378_s4 + $0xb8] sm:$0xff]  ;;  %v3467_v20 = vld [vmem:[%s5378_s4 + $0xd0] sm:$0xff]  ;;  %v3506_v50 = vld [vmem:[%s5378_s4 + $0x148] sm:$0xff] }
 0x1ef   : > { %v1781_v23 = vadd.f32 %v3405_v55, %v1766_v19  ;;  %1808 = vrot.lane.b32.xlu1 %v1787_v18, %s4453_s22  ;;  %v4262_v17 = vpack.c.bf16 %v3456_v16, %v3455_v15  ;;  %v3457_v18 = vld [vmem:[%s5378_s4 + $0xc0] sm:$0xff]  ;;  %v3466_v19 = vld [vmem:[%s5378_s4 + $0xc8] sm:$0xff] }
 0x1f0   : > { %v1780_v24 = vadd.f32 %v3405_v55, %v1765_v22  ;;  %1806 = vrot.lane.b32.xlu0 %v1786_v21, %s4453_s22  ;;  %v3431_v55 = vld [vmem:[%s5378_s4 + $0x70] sm:$0xff]  ;;  %v4266_v21 = vpack.c.bf16 %v3467_v20, %v3466_v19 }
 0x1f1   : > { %v1789_v25 = vmax.f32 %v1781_v23, 0.0  ;;  %v3468_v23 = vld [vmem:[%s5378_s4 + $0xd8] sm:$0xff] }
 0x1f2   : > { %v1788_v26 = vmax.f32 %v1780_v24, 0.0  ;;  %v3469_v24 = vld [vmem:[%s5378_s4 + $0xe0] sm:$0xff] }
 0x1f3   : > { %1812 = vrot.lane.b32.xlu1 %v1789_v25, %s4453_s22  ;;  %v4270_v25 = vpack.c.bf16 %v3469_v24, %v3468_v23 }
 0x1f4   : > { %1810 = vrot.lane.b32.xlu0 %v1788_v26, %s4453_s22  ;;  %v3470_v26 = vld [vmem:[%s5378_s4 + $0xe8] sm:$0xff] }
 0x259   : > { %v1801_v27 = vpop.permute.xlu1 %1800 }
 0x25a   : > { %1823 = vst.msk [vmem:[#allocation3 + $0x21] sm:$0xff] %vm400_vm5, %v1801_v27  ;;  %v1799_v28 = vpop.permute.xlu0 %1798  ;;  %v3479_v27 = vld [vmem:[%s5378_s4 + $0xf0] sm:$0xff] }
 0x25b   : > { %1822 = vst.msk [vmem:[#allocation3 + $0x11] sm:$0xff] %vm400_vm5, %v1799_v28  ;;  %v3480_v28 = vld [vmem:[%s5378_s4 + $0xf8] sm:$0xff] }
 0x25d   : > { %v1805_v29 = vpop.permute.xlu1 %1804 }
 0x25e   : > { %1825 = vst.msk [vmem:[#allocation3 + $0x41] sm:$0xff] %vm400_vm5, %v1805_v29  ;;  %v1803_v32 = vpop.permute.xlu0 %1802  ;;  %v4274_v29 = vpack.c.bf16 %v3480_v28, %v3479_v27 }
 0x25f   : > { %1824 = vst.msk [vmem:[#allocation3 + $0x31] sm:$0xff] %vm400_vm5, %v1803_v32 }
 0x261   : > { %v1809_v36 = vpop.permute.xlu1 %1808  ;;  %v5055_v43 = vld [vmem:[#allocation3 + $0x21] sm:$0xff] }
 0x262   : > { %1827 = vst.msk [vmem:[#allocation3 + $0x61] sm:$0xff] %vm400_vm5, %v1809_v36  ;;  %v1807_v40 = vpop.permute.xlu0 %1806  ;;  %v5050_v42 = vld [vmem:[#allocation3 + $0x11] sm:$0xff]  ;;  %v5098_v54 = vld [vmem:[#allocation3 + $0x20] sm:$0xff]  ;;  %v4278_v36 = vpack.c.bf16 %v3482_v35, %v3481_v34 }
 0x263   : > { %1826 = vst.msk [vmem:[#allocation3 + $0x51] sm:$0xff] %vm400_vm5, %v1807_v40  ;;  %3967 = vmatmul.mubr.msk.f32.vlgmr.msra.gmra.mrb[0].mxu1 %vm279_vm2, %v5050_v42  ;;  %v1831_v53 = vld [vmem:[#allocation3 + $0x10] sm:$0xff]  ;;  %v5142_v5 = vld [vmem:[#allocation3 + $0x22] sm:$0xff]  ;;  %v3492_v40 = vld [vmem:[%s5378_s4 + $0x118] sm:$0xff] }
 0x264   : > { %4237 = vmatpush3.bf16.msra.mxu1 %v4234_v63  ;;  %3969 = vmatprep.mubr.msk.f32.mxu1 %vm279_vm2, %v5055_v43  ;;  %v2115_v63 = vld [vmem:[#allocation3 + $0x2] sm:$0xff]  ;;  %v5138_v4 = vld [vmem:[#allocation3 + $0x12] sm:$0xff] }
 0x265   : > { %v1813_v44 = vpop.permute.xlu1 %1812  ;;  %4239 = vmatprep.subr.bf16.mxu1 %v4238_v37  ;;  %v5074_v30 = vld [vmem:[#allocation3 + $0x41] sm:$0xff] }
 0x266   : > { %1829 = vst.msk [vmem:[#allocation3 + $0x81] sm:$0xff] %vm400_vm5, %v1813_v44  ;;  %v1811_v46 = vpop.permute.xlu0 %1810  ;;  %v5063_v47 = vld [vmem:[#allocation3 + $0x31] sm:$0xff]  ;;  %v5115_v59 = vld [vmem:[#allocation3 + $0x40] sm:$0xff] }
 0x267   : > { %1828 = vst.msk [vmem:[#allocation3 + $0x71] sm:$0xff] %vm400_vm5, %v1811_v46  ;;  %3970 = vmatmul.mubr.msk.f32.gmra.mrb[2].mxu1 %vm279_vm2, %v5063_v47  ;;  %v5105_v56 = vld [vmem:[#allocation3 + $0x30] sm:$0xff]  ;;  %v5159_v10 = vld [vmem:[#allocation3 + $0x42] sm:$0xff] }
 0x268   : > { %3972 = vmatprep.mubr.msk.f32.mxu1 %vm279_vm2, %v5074_v30  ;;  %4241 = vmatpush3.bf16.msra.mxu1 %v4238_v37  ;;  %v5149_v7 = vld [vmem:[#allocation3 + $0x32] sm:$0xff]  ;;  %v3494_v46 = vld [vmem:[%s5378_s4 + $0x128] sm:$0xff] }
 0x269   : > { %3986 = vmatprep.subr.mxu1 %v1842_v45  ;;  %v5082_v38 = vld [vmem:[#allocation3 + $0x61] sm:$0xff]  ;;  %v3483_v37 = vld [vmem:[%s5378_s4 + $0x110] sm:$0xff]  ;;  %v4286_v49 = vpack.c.bf16 %v3495_v48, %v3494_v46 }
 0x26a   : > { %v5078_v33 = vld [vmem:[#allocation3 + $0x51] sm:$0xff]  ;;  %v5123_v62 = vld [vmem:[#allocation3 + $0x60] sm:$0xff] }
 0x26b   : > { %3973 = vmatmul.mubr.msk.f32.gmra.mrb[4].mxu1 %vm279_vm2, %v5078_v33  ;;  %v5119_v61 = vld [vmem:[#allocation3 + $0x50] sm:$0xff]  ;;  %v5167_v13 = vld [vmem:[#allocation3 + $0x62] sm:$0xff] }
 0x26c   : > { %3975 = vmatprep.mubr.msk.f32.mxu1 %vm279_vm2, %v5082_v38  ;;  %3987 = vmatpush3.msra.mxu1 %v1842_v45  ;;  %v5163_v12 = vld [vmem:[#allocation3 + $0x52] sm:$0xff] }
 0x26d   : > { %4243 = vmatprep.subr.bf16.mxu1 %v4242_v31  ;;  %v5203_v22 = vld [vmem:[#allocation3 + $0x80] sm:$0xff] }
 0x26e   : > { %v5086_v41 = vld [vmem:[#allocation3 + $0x71] sm:$0xff]  ;;  %v2424_v32 = vld [vmem:[#allocation3 + $0x81] sm:$0xff] }
 0x26f   : > { %3976 = vmatmul.mubr.msk.f32.gmra.mrb[6].mxu1 %vm279_vm2, %v5086_v41  ;;  %v5127_v0 = vld [vmem:[#allocation3 + $0x70] sm:$0xff]  ;;  %v2575_v45 = vld [vmem:[#allocation3 + $0x82] sm:$0xff] }
 0x270   : > { %3988 = vmatprep.mubr.msk.f32.mxu1 %vm279_vm2, %v1830_v39  ;;  %v5171_v14 = vld [vmem:[#allocation3 + $0x72] sm:$0xff]  ;;  %v3505_v39 = vld [vmem:[%s5378_s4 + $0x140] sm:$0xff] }
 0x271   : > { %v4290_v51 = vpack.c.bf16 %v3506_v50, %v3505_v39 }
 0x273   : > { %3989 = vmatmul.mubr.msk.f32.vlgmr.msra.gmra.mrb[0].mxu1 %vm279_vm2, %v1831_v53 }
 0x274   : > { %4245 = vmatpush3.bf16.msra.mxu1 %v4242_v31  ;;  %3991 = vmatprep.mubr.msk.f32.mxu1 %vm279_vm2, %v5098_v54  ;;  %v3496_v31 = vld [vmem:[%s5378_s4 + $0x138] sm:$0xff] }
 0x275   : > { %4247 = vmatprep.subr.bf16.mxu1 %v4246_v52 }
 0x277   : > { %3992 = vmatmul.mubr.msk.f32.gmra.mrb[2].mxu1 %vm279_vm2, %v5105_v56 }
 0x278   : > { %3994 = vmatprep.mubr.msk.f32.mxu1 %vm279_vm2, %v5115_v59  ;;  %4249 = vmatpush3.bf16.msra.mxu1 %v4246_v52  ;;  %v2727_v52 = vld [vmem:[#allocation3 + $0x90] sm:$0xff] }
 0x279   : > { %4008 = vmatprep.subr.mxu1 %v3431_v55 }
 0x27b   : > { %3995 = vmatmul.mubr.msk.f32.gmra.mrb[4].mxu1 %vm279_vm2, %v5119_v61 }
 0x27c   : > { %3997 = vmatprep.mubr.msk.f32.mxu1 %vm279_vm2, %v5123_v62  ;;  %4009 = vmatpush3.msra.mxu1 %v3431_v55 }
 0x27d   : > { %4251 = vmatprep.subr.bf16.mxu1 %v4250_v60 }
 0x27f   : > { %3998 = vmatmul.mubr.msk.f32.gmra.mrb[6].mxu1 %vm279_vm2, %v5127_v0 }
 0x280   : > { %4010 = vmatprep.mubr.msk.f32.mxu1 %vm279_vm2, %v2115_v63 }
 0x283   : > { %4011 = vmatmul.mubr.msk.f32.vlgmr.msra.gmra.mrb[0].mxu1 %vm279_vm2, %v5138_v4 }
 0x284   : > { %4253 = vmatpush3.bf16.msra.mxu1 %v4250_v60  ;;  %4013 = vmatprep.mubr.msk.f32.mxu1 %vm279_vm2, %v5142_v5 }
 0x285   : > { %4255 = vmatprep.subr.bf16.mxu1 %v4254_v3 }
 0x287   : > { %4014 = vmatmul.mubr.msk.f32.gmra.mrb[2].mxu1 %vm279_vm2, %v5149_v7 }
 0x288   : > { %4016 = vmatprep.mubr.msk.f32.mxu1 %vm279_vm2, %v5159_v10  ;;  %4257 = vmatpush3.bf16.msra.mxu1 %v4254_v3 }
 0x289   : > { %4030 = vmatprep.subr.mxu1 %v3444_v6 }
 0x28b   : > { %4017 = vmatmul.mubr.msk.f32.gmra.mrb[4].mxu1 %vm279_vm2, %v5163_v12 }
 0x28c   : > { %4019 = vmatprep.mubr.msk.f32.mxu1 %vm279_vm2, %v5167_v13  ;;  %4031 = vmatpush3.msra.mxu1 %v3444_v6 }
 0x28d   : > { %4259 = vmatprep.subr.bf16.mxu1 %v4258_v11 }
 0x28f   : > { %4020 = vmatmul.mubr.msk.f32.gmra.mrb[6].mxu1 %vm279_vm2, %v5171_v14 }
 0x290   : > { %4032 = vmatprep.mubr.msk.f32.mxu1 %vm279_vm2, %v1831_v53  ;;  %v3507_v53 = vld [vmem:[%s5378_s4 + $0x150] sm:$0xff] }
 0x293   : > { %4033 = vmatmul.mubr.msk.f32.vlgmr.msra.gmra.mrb[0].mxu1 %vm279_vm2, %v5098_v54 }
 0x294   : > { %4261 = vmatpush3.bf16.msra.mxu1 %v4258_v11  ;;  %4035 = vmatprep.mubr.msk.f32.mxu1 %vm279_vm2, %v5105_v56 }
 0x295   : > { %4263 = vmatprep.subr.bf16.mxu1 %v4262_v17 }
 0x297   : > { %4036 = vmatmul.mubr.msk.f32.gmra.mrb[2].mxu1 %vm279_vm2, %v5115_v59 }
 0x298   : > { %4038 = vmatprep.mubr.msk.f32.mxu1 %vm279_vm2, %v5119_v61  ;;  %4265 = vmatpush3.bf16.msra.mxu1 %v4262_v17 }
 0x299   : > { %4052 = vmatprep.subr.mxu1 %v3457_v18 }
 0x29b   : > { %4039 = vmatmul.mubr.msk.f32.gmra.mrb[4].mxu1 %vm279_vm2, %v5123_v62 }
 0x29c   : > { %4041 = vmatprep.mubr.msk.f32.mxu1 %vm279_vm2, %v5127_v0  ;;  %4053 = vmatpush3.msra.mxu1 %v3457_v18 }
 0x29d   : > { %4267 = vmatprep.subr.bf16.mxu1 %v4266_v21 }
 0x29f   : > { %4042 = vmatmul.mubr.msk.f32.gmra.mrb[6].mxu1 %vm279_vm2, %v5203_v22 }
 0x2a0   : > { %4054 = vmatprep.mubr.msk.f32.mxu1 %vm279_vm2, %v5050_v42  ;;  %v3493_v42 = vld [vmem:[%s5378_s4 + $0x120] sm:$0xff] }
 0x2a1   : > { %v4282_v44 = vpack.c.bf16 %v3493_v42, %v3492_v40  ;;  %v4443_v40 = vld [vmem:[%s4678_s15 + $0x30] sm:$0xff] }
 0x2a3   : > { %4055 = vmatmul.mubr.msk.f32.vlgmr.msra.gmra.mrb[0].mxu1 %vm279_vm2, %v5055_v43 }
 0x2a4   : > { %4269 = vmatpush3.bf16.msra.mxu1 %v4266_v21  ;;  %4057 = vmatprep.mubr.msk.f32.mxu1 %vm279_vm2, %v5063_v47 }
 0x2a5   : > { %4271 = vmatprep.subr.bf16.mxu1 %v4270_v25 }
 0x2a7   : > { %4058 = vmatmul.mubr.msk.f32.gmra.mrb[2].mxu1 %vm279_vm2, %v5074_v30 }
 0x2a8   : > { %4060 = vmatprep.mubr.msk.f32.mxu1 %vm279_vm2, %v5078_v33  ;;  %4273 = vmatpush3.bf16.msra.mxu1 %v4270_v25 }
 0x2a9   : > { %4074 = vmatprep.subr.mxu1 %v3470_v26 }
 0x2ab   : > { %4061 = vmatmul.mubr.msk.f32.gmra.mrb[4].mxu1 %vm279_vm2, %v5082_v38 }
 0x2ac   : > { %4063 = vmatprep.mubr.msk.f32.mxu1 %vm279_vm2, %v5086_v41  ;;  %4075 = vmatpush3.msra.mxu1 %v3470_v26  ;;  %v4441_v26 = vld [vmem:[%s4678_s15 + $0x20] sm:$0xff] }
 0x2ad   : > { %4275 = vmatprep.subr.bf16.mxu1 %v4274_v29 }
 0x2af   : > { %4064 = vmatmul.mubr.msk.f32.gmra.mrb[6].mxu1 %vm279_vm2, %v2424_v32 }
 0x2b0   : > { %4076 = vmatprep.mubr.msk.f32.mxu1 %vm279_vm2, %v5138_v4 }
 0x2b3   : > { %4077 = vmatmul.mubr.msk.f32.vlgmr.msra.gmra.mrb[0].mxu1 %vm279_vm2, %v5142_v5 }
 0x2b4   : > { %4277 = vmatpush3.bf16.msra.mxu1 %v4274_v29  ;;  %4079 = vmatprep.mubr.msk.f32.mxu1 %vm279_vm2, %v5149_v7 }
 0x2b5   : > { %4279 = vmatprep.subr.bf16.mxu1 %v4278_v36 }
 0x2b7   : > { %4080 = vmatmul.mubr.msk.f32.gmra.mrb[2].mxu1 %vm279_vm2, %v5159_v10 }
 0x2b8   : > { %4082 = vmatprep.mubr.msk.f32.mxu1 %vm279_vm2, %v5163_v12  ;;  %4281 = vmatpush3.bf16.msra.mxu1 %v4278_v36  ;;  %v4442_v36 = vld [vmem:[%s4678_s15 + $0x38] sm:$0xff] }
 0x2b9   : > { %4096 = vmatprep.subr.mxu1 %v3483_v37 }
 0x2bb   : > { %4083 = vmatmul.mubr.msk.f32.gmra.mrb[4].mxu1 %vm279_vm2, %v5167_v13 }
 0x2bc   : > { %4085 = vmatprep.mubr.msk.f32.mxu1 %vm279_vm2, %v5171_v14  ;;  %4097 = vmatpush3.msra.mxu1 %v3483_v37 }
 0x2bd   : > { %4283 = vmatprep.subr.bf16.mxu1 %v4282_v44 }
 0x2bf   : > { %4086 = vmatmul.mubr.msk.f32.gmra.mrb[6].mxu1 %vm279_vm2, %v2575_v45 }
 0x2c0   : > { %4098 = vmatprep.mubr.msk.f32.mxu1 %vm279_vm2, %v5098_v54  ;;  %v3508_v54 = vld [vmem:[%s5378_s4 + $0x158] sm:$0xff] }
 0x2c1   : > { %v4294_v55 = vpack.c.bf16 %v3508_v54, %v3507_v53 }
 0x2c3   : > { %4099 = vmatmul.mubr.msk.f32.vlgmr.msra.gmra.mrb[0].mxu1 %vm279_vm2, %v5105_v56  ;;  %v3509_v56 = vld [vmem:[%s5378_s4 + $0x160] sm:$0xff] }
 0x2c4   : > { %4285 = vmatpush3.bf16.msra.mxu1 %v4282_v44  ;;  %4101 = vmatprep.mubr.msk.f32.mxu1 %vm279_vm2, %v5115_v59 }
 0x2c5   : > { %4287 = vmatprep.subr.bf16.mxu1 %v4286_v49 }
 0x2c7   : > { %4102 = vmatmul.mubr.msk.f32.gmra.mrb[2].mxu1 %vm279_vm2, %v5119_v61 }
 0x2c8   : > { %4104 = vmatprep.mubr.msk.f32.mxu1 %vm279_vm2, %v5123_v62  ;;  %4289 = vmatpush3.bf16.msra.mxu1 %v4286_v49  ;;  %v4436_v62 = vld [vmem:[%s4678_s15 + $0x8] sm:$0xff] }
 0x2c9   : > { %4118 = vmatprep.subr.mxu1 %v3496_v31 }
 0x2cb   : > { %4105 = vmatmul.mubr.msk.f32.gmra.mrb[4].mxu1 %vm279_vm2, %v5127_v0 }
 0x2cc   : > { %4107 = vmatprep.mubr.msk.f32.mxu1 %vm279_vm2, %v5203_v22  ;;  %4119 = vmatpush3.msra.mxu1 %v3496_v31  ;;  %v4440_v22 = vld [vmem:[%s4678_s15 + $0x28] sm:$0xff] }
 0x2cd   : > { %4291 = vmatprep.subr.bf16.mxu1 %v4290_v51 }
 0x2cf   : > { %4108 = vmatmul.mubr.msk.f32.gmra.mrb[6].mxu1 %vm279_vm2, %v2727_v52 }
 0x2d0   : > { %4120 = vmatprep.mubr.msk.f32.mxu1 %vm279_vm2, %v5055_v43  ;;  %v2878_v43 = vld [vmem:[#allocation3 + $0x91] sm:$0xff] }
 0x2d3   : > { %4121 = vmatmul.mubr.msk.f32.vlgmr.msra.gmra.mrb[0].mxu1 %vm279_vm2, %v5063_v47  ;;  %v3029_v47 = vld [vmem:[#allocation3 + $0x92] sm:$0xff] }
 0x2d4   : > { %4293 = vmatpush3.bf16.msra.mxu1 %v4290_v51  ;;  %4123 = vmatprep.mubr.msk.f32.mxu1 %vm279_vm2, %v5074_v30  ;;  %v3518_v30 = vld [vmem:[%s5379_s5] ss:$0 sm:$0xff] }
 0x2d5   : > { %4295 = vmatprep.subr.bf16.mxu1 %v4294_v55 }
 0x2d7   : > { %4124 = vmatmul.mubr.msk.f32.gmra.mrb[2].mxu1 %vm279_vm2, %v5078_v33 }
 0x2d8   : > { %4126 = vmatprep.mubr.msk.f32.mxu1 %vm279_vm2, %v5082_v38  ;;  %4297 = vmatpush3.bf16.msra.mxu1 %v4294_v55  ;;  %v3519_v38 = vld [vmem:[%s5380_s6] ss:$0 sm:$0xff] }
 0x2d9   : > { %4140 = vmatprep.subr.mxu1 %v3509_v56 }
 0x2db   : > { %4127 = vmatmul.mubr.msk.f32.gmra.mrb[4].mxu1 %vm279_vm2, %v5086_v41 }
 0x2dc   : > { %4129 = vmatprep.mubr.msk.f32.mxu1 %vm279_vm2, %v2424_v32  ;;  %4141 = vmatpush3.msra.mxu1 %v3509_v56 }
 0x2df   : > { %4130 = vmatmul.mubr.msk.f32.gmra.mrb[6].mxu1 %vm279_vm2, %v2878_v43 }
 0x2e0   : > { %4142 = vmatprep.mubr.msk.f32.mxu1 %vm279_vm2, %v5142_v5 }
 0x2e3   : > { %4143 = vmatmul.mubr.msk.f32.vlgmr.msra.gmra.mrb[0].mxu1 %vm279_vm2, %v5149_v7 }
 0x2e4   : > { %4145 = vmatprep.mubr.msk.f32.mxu1 %vm279_vm2, %v5159_v10  ;;  %v4438_v10 = vld [vmem:[%s4678_s15 + $0x18] sm:$0xff] }
 0x2e7   : > { %4146 = vmatmul.mubr.msk.f32.gmra.mrb[2].mxu1 %vm279_vm2, %v5163_v12 }
 0x2e8   : > { %4148 = vmatprep.mubr.msk.f32.mxu1 %vm279_vm2, %v5167_v13 }
 0x2eb   : > { %4149 = vmatmul.mubr.msk.f32.gmra.mrb[4].mxu1 %vm279_vm2, %v5171_v14  ;;  %v4439_v14 = vld [vmem:[%s4678_s15 + $0x10] sm:$0xff] }
 0x2ec   : > { %4151 = vmatprep.mubr.msk.f32.mxu1 %vm279_vm2, %v2575_v45 }
 0x2ef   : > { %4152 = vmatmul.mubr.msk.f32.gmra.mrb[6].mxu1 %vm279_vm2, %v3029_v47 }
 0x3b6   : > { %v4144_v33 = vpop.f32.mrb[0].mxu1 }
 0x3b7   : > { %v3181_v41 = vmul.f32 %v4144_v33, %v3518_v30  ;;  %v3126_v57 = vpop.f32.mrb[1].mxu1 }
 0x3b8   : > { %v3180_v58 = vmul.f32 %v3518_v30, %v3126_v57 }
 0x3b9   : > { %v3196_v59 = vadd.f32 %v3519_v38, %v3181_v41 }
 0x3ba   : > { %v3195_v60 = vadd.f32 %v3519_v38, %v3180_v58  ;;  %v4147_v61 = vpop.f32.mrb[2].mxu1 }
 0x3bb   : > { %v3204_v63 = vadd.f32 %v4436_v62, %v3196_v59  ;;  %v3183_v0 = vmul.f32 %v4147_v61, %v3518_v30  ;;  %v3136_v1 = vpop.f32.mrb[3].mxu1 }
 0x3bc   : > { %v3203_v3 = vadd.f32 %v4437_v2, %v3195_v60  ;;  %v3182_v4 = vmul.f32 %v3518_v30, %v3136_v1 }
 0x3bd   : > { %v3212_v5 = vmax.f32 %v3204_v63, 0.0  ;;  %v3198_v6 = vadd.f32 %v3519_v38, %v3183_v0 }
 0x3be   : > { %v3211_v7 = vmax.f32 %v3203_v3, 0.0  ;;  %v3197_v8 = vadd.f32 %v3519_v38, %v3182_v4  ;;  %v4150_v9 = vpop.f32.mrb[4].mxu1 }
 0x3bf   : > { %3221 = vst.msk [vmem:[%s5346_s11 + $0x8] sm:$0xff] %vm3219_vm6, %v3212_v5  ;;  %v3206_v11 = vadd.f32 %v4438_v10, %v3198_v6  ;;  %v3185_v12 = vmul.f32 %v4150_v9, %v3518_v30  ;;  %v3146_v13 = vpop.f32.mrb[5].mxu1 }
 0x3c0   : > { %3220 = vst.msk [vmem:[%s5346_s11] sm:$0xff] %vm3219_vm6, %v3211_v7  ;;  %v3205_v15 = vadd.f32 %v4439_v14, %v3197_v8  ;;  %v3184_v16 = vmul.f32 %v3518_v30, %v3146_v13 }
 0x3c1   : > { %v3214_v17 = vmax.f32 %v3206_v11, 0.0  ;;  %v3200_v18 = vadd.f32 %v3519_v38, %v3185_v12 }
 0x3c2   : > { %v3213_v19 = vmax.f32 %v3205_v15, 0.0  ;;  %v3199_v20 = vadd.f32 %v3519_v38, %v3184_v16  ;;  %v4153_v21 = vpop.f32.mrb[6].mxu1 }
 0x3c3   : > { %3223 = vst.msk [vmem:[%s5346_s11 + $0x18] sm:$0xff] %vm3219_vm6, %v3214_v17  ;;  %v3208_v23 = vadd.f32 %v4440_v22, %v3200_v18  ;;  %v3187_v24 = vmul.f32 %v4153_v21, %v3518_v30  ;;  %v3156_v25 = vpop.f32.mrb[7].mxu1 }
 0x3c4   : > { %3222 = vst.msk [vmem:[%s5346_s11 + $0x10] sm:$0xff] %vm3219_vm6, %v3213_v19  ;;  %v3207_v27 = vadd.f32 %v4441_v26, %v3199_v20  ;;  %v3186_v28 = vmul.f32 %v3518_v30, %v3156_v25 }
 0x3c5   : > { %v3216_v29 = vmax.f32 %v3208_v23, 0.0  ;;  %v3202_v32 = vadd.f32 %v3519_v38, %v3187_v24 }
 0x3c6   : > { %v3215_v34 = vmax.f32 %v3207_v27, 0.0  ;;  %v3201_v35 = vadd.f32 %v3519_v38, %v3186_v28 }
 0x3c7   : > { %3225 = vst.msk [vmem:[%s5346_s11 + $0x28] sm:$0xff] %vm3219_vm6, %v3216_v29  ;;  %v3210_v37 = vadd.f32 %v4442_v36, %v3202_v32 }
 0x3c8   : > { %3224 = vst.msk [vmem:[%s5346_s11 + $0x20] sm:$0xff] %vm3219_vm6, %v3215_v34  ;;  %v3209_v42 = vadd.f32 %v4443_v40, %v3201_v35 }
 0x3c9   : > { %v3218_v44 = vmax.f32 %v3210_v37, 0.0 }
 0x3ca   : > { %v3217_v45 = vmax.f32 %v3209_v42, 0.0 }
 0x3cb   : > { %3227 = vst.msk [vmem:[%s5346_s11 + $0x38] sm:$0xff] %vm3219_vm6, %v3218_v44 }
 0x3cc   : > { %3226 = vst.msk [vmem:[%s5346_s11 + $0x30] sm:$0xff] %vm3219_vm6, %v3217_v45 }
 0x3cd PF: > { %s17_s24 = sadd.s32 1, %s4450_s24  }
 0x3ce   : > { %p14_p4 = scmp.ge.s32.totalorder %s17_s24, 4  }
 0x3d0   :  { %16 = sbr.rel (!%p14_p4) target bundleno = 1 (0x1), region = 100 }

</bundles_post_ra>
